<compile_context>
chip_gen: v6e
topology: v6e:2x2x1
jax: 0.10.0
libtpu: 0.0.40
codegen_flags: <defaults>
</compile_context>

<pallas_src>
import functools

import numpy as np

import jax
import jax.numpy as jnp
from jax import lax
from jax.experimental import pallas as pl
from jax.experimental.pallas import tpu as pltpu


def _pool_bn_kernel(x_ref, recip_ref, gamma_ref, beta_ref, o_ref, *,
                    pool_type, k, s, p, eps):
    # x_ref block: (N, H, W, Cb) with channels on the lane axis.
    x = x_ref[...].astype(jnp.float32)
    N, H, W, Cb = x.shape
    Ho = (H + 2 * p - k) // s + 1
    Wo = (W + 2 * p - k) // s + 1
    Wp = W + 2 * p

    def rows(arr, ki):
        # rows ki, ki+s, ..., ki+(Ho-1)*s of the H-padded array (leading axis).
        return lax.slice(arr, (0, ki, 0, 0),
                         (N, ki + (Ho - 1) * s + 1, Wp, Cb), (1, s, 1, 1))

    def cols(arr, kj):
        # cols kj, kj+s, ..., kj+(Wo-1)*s (sublane axis).
        return lax.slice(arr, (0, 0, kj, 0),
                         (N, Ho, kj + (Wo - 1) * s + 1, Cb), (1, 1, s, 1))

    if pool_type == "max":
        xp = jnp.pad(x, ((0, 0), (p, p), (p, p), (0, 0)),
                     constant_values=-jnp.inf)
        hp = rows(xp, 0)
        for ki in range(1, k):
            hp = jnp.maximum(hp, rows(xp, ki))
        pooled = cols(hp, 0)
        for kj in range(1, k):
            pooled = jnp.maximum(pooled, cols(hp, kj))
    else:  # 'avg' with count_include_pad=False
        xp = jnp.pad(x, ((0, 0), (p, p), (p, p), (0, 0)), constant_values=0.0)
        hp = rows(xp, 0)
        for ki in range(1, k):
            hp = hp + rows(xp, ki)
        pooled = cols(hp, 0)
        for kj in range(1, k):
            pooled = pooled + cols(hp, kj)
        # static (1, Ho, Wo, 1) reciprocal of the valid-element count.
        pooled = pooled * recip_ref[...]

    # BatchNorm2d, training-mode batch statistics, one pass per channel (lane):
    # mean = s1/cnt, var = s2/cnt - mean^2 (biased, like PyTorch BN).
    cnt = float(N * Ho * Wo)
    s1 = jnp.sum(pooled, axis=(0, 1, 2), keepdims=True)           # (1,1,1,Cb)
    s2 = jnp.sum(pooled * pooled, axis=(0, 1, 2), keepdims=True)  # (1,1,1,Cb)
    mean = s1 * (1.0 / cnt)
    var = jnp.maximum(s2 * (1.0 / cnt) - mean * mean, 0.0)
    inv = lax.rsqrt(var + eps)

    gamma = gamma_ref[...].astype(jnp.float32)                    # (1,1,1,Cb)
    beta = beta_ref[...].astype(jnp.float32)                      # (1,1,1,Cb)
    scale = inv * gamma
    shift = beta - mean * scale
    # fused normalize + affine in the single lane-dense store.
    o_ref[...] = (pooled * scale + shift).astype(o_ref.dtype)


def _choose_channel_block(N, H, W, C, itemsize, budget_bytes=2 << 20):
    """Largest lane-aligned channel block whose input slab fits the budget."""
    if C % 128 != 0:
        return C                      # small / irregular C: take it whole
    cb = 128
    while C % (cb * 2) == 0 and N * H * W * (cb * 2) * itemsize <= budget_bytes:
        cb *= 2
    return cb


def pool_bn(x, gamma, beta, *, pool_type="avg", kernel_size=3, stride=1,
            padding=1, eps=1e-5):
    """x: (N, C, H, W). gamma, beta: (C,). Returns (N, C, Ho, Wo)."""
    N, C, H, W = x.shape
    k, s, p = kernel_size, stride, padding
    Ho = (H + 2 * p - k) // s + 1
    Wo = (W + 2 * p - k) // s + 1

    # Layout plumbing: channels onto the lane axis (NCHW -> NHWC).
    x_nhwc = jnp.transpose(x, (0, 2, 3, 1))
    gamma4 = gamma.reshape(1, 1, 1, C)
    beta4 = beta.reshape(1, 1, 1, C)

    # Static per-output-pixel reciprocal of the number of valid (non-pad)
    # inputs (AvgPool2d count_include_pad=False). Unused ones for max pooling.
    if pool_type == "avg":
        ch = (np.minimum(np.arange(Ho) * s - p + k, H)
              - np.maximum(np.arange(Ho) * s - p, 0))
        cw = (np.minimum(np.arange(Wo) * s - p + k, W)
              - np.maximum(np.arange(Wo) * s - p, 0))
        recip = (1.0 / (ch[:, None] * cw[None, :])).astype(np.float32)
    else:
        recip = np.ones((Ho, Wo), np.float32)
    recip = jnp.asarray(recip.reshape(1, Ho, Wo, 1))

    cb = _choose_channel_block(N, H, W, C, x.dtype.itemsize)
    grid = (C // cb,)
    # TODO(synk): for very large N*H*W add a spatial grid axis with a (k-1)
    # halo and a two-pass BN; here the full spatial slab fits VMEM per step.

    kernel = functools.partial(_pool_bn_kernel, pool_type=pool_type,
                               k=k, s=s, p=p, eps=eps)

    out_nhwc = pl.pallas_call(
        kernel,
        out_shape=jax.ShapeDtypeStruct((N, Ho, Wo, C), x.dtype),
        grid=grid,
        in_specs=[
            pl.BlockSpec((N, H, W, cb), lambda c: (0, 0, 0, c)),
            pl.BlockSpec((1, Ho, Wo, 1), lambda c: (0, 0, 0, 0)),
            pl.BlockSpec((1, 1, 1, cb), lambda c: (0, 0, 0, c)),
            pl.BlockSpec((1, 1, 1, cb), lambda c: (0, 0, 0, c)),
        ],
        out_specs=pl.BlockSpec((N, Ho, Wo, cb), lambda c: (0, 0, 0, c)),
        compiler_params=pltpu.CompilerParams(
            dimension_semantics=("parallel",),
            vmem_limit_bytes=32 * 1024 * 1024),
    )(x_nhwc, recip, gamma4, beta4)

    return jnp.transpose(out_nhwc, (0, 3, 1, 2))


# ------------------------- pure-JAX reference -------------------------------
def _pool_bn_ref(x, gamma, beta, *, pool_type, kernel_size, stride, padding,
                 eps=1e-5):
    k, s, p = kernel_size, stride, padding
    win = (1, 1, k, k)
    strides = (1, 1, s, s)
    pads = ((0, 0), (0, 0), (p, p), (p, p))
    if pool_type == "max":
        pooled = lax.reduce_window(x, -jnp.inf, lax.max, win, strides, pads)
    else:
        ssum = lax.reduce_window(x, 0.0, lax.add, win, strides, pads)
        csum = lax.reduce_window(jnp.ones_like(x), 0.0, lax.add, win, strides,
                                 pads)
        pooled = ssum / csum
    mean = jnp.mean(pooled, axis=(0, 2, 3), keepdims=True)
    var = jnp.mean((pooled - mean) ** 2, axis=(0, 2, 3), keepdims=True)
    y = (pooled - mean) * lax.rsqrt(var + eps)
    return y * gamma[None, :, None, None] + beta[None, :, None, None]


if __name__ == "__main__":
    key = jax.random.PRNGKey(0)
    N, C, H, W = 2, 4, 16, 16
    x = jax.random.normal(key, (N, C, H, W), dtype=jnp.float32)

    # Fresh BatchNorm2d(affine=True) parameters: weight=1, bias=0.
    gamma = jnp.ones((C,), dtype=jnp.float32)
    beta = jnp.zeros((C,), dtype=jnp.float32)

    ok = True
    for pool_type in ("avg", "max"):
        for (k, s, p) in ((3, 1, 1), (3, 2, 1)):
            out = pool_bn(x, gamma, beta, pool_type=pool_type,
                          kernel_size=k, stride=s, padding=p)
            out = jax.block_until_ready(out)
            ref = _pool_bn_ref(x, gamma, beta, pool_type=pool_type,
                               kernel_size=k, stride=s, padding=p)
            if not jnp.allclose(out, ref, atol=1e-4, rtol=1e-4):
                ok = False
                print(f"MISMATCH pool={pool_type} k={k} s={s} p={p}: "
                      f"max abs err {jnp.max(jnp.abs(out - ref))}")

    if ok:
        print("KERNEL_OK")
</pallas_src>

<mosaic_0001>
module attributes {stable_mosaic.version = 11 : i64} {
  func.func @_pool_bn_kernel(%arg0: i32, %arg1: memref<2x16x16x4xf32, #tpu.memory_space<vmem>>, %arg2: memref<1x16x16x1xf32, #tpu.memory_space<vmem>>, %arg3: memref<1x1x1x4xf32, #tpu.memory_space<vmem>>, %arg4: memref<1x1x1x4xf32, #tpu.memory_space<vmem>>, %arg5: memref<2x16x16x4xf32, #tpu.memory_space<vmem>>) attributes {dimension_semantics = [#tpu.dimension_semantics<parallel>], iteration_bounds = array<i64: 1>, scalar_prefetch = 0 : i64, scratch_operands = 0 : i64, tpu.core_type = #tpu.core_type<tc>, window_params = [{transform_indices = @transform_0, window_bounds = array<i64: 2, 16, 16, 4>}, {pipeline_mode = #tpu.pipeline_mode<synchronous>, transform_indices = @transform_1, window_bounds = array<i64: 1, 16, 16, 1>}, {transform_indices = @transform_2, window_bounds = array<i64: 1, 1, 1, 4>}, {transform_indices = @transform_3, window_bounds = array<i64: 1, 1, 1, 4>}, {transform_indices = @transform_4, window_bounds = array<i64: 2, 16, 16, 4>}]} {
    %c0 = arith.constant 0 : index
    %c0_0 = arith.constant 0 : index
    %c0_1 = arith.constant 0 : index
    %c0_2 = arith.constant 0 : index
    %0 = vector.load %arg1[%c0, %c0_0, %c0_1, %c0_2] : memref<2x16x16x4xf32, #tpu.memory_space<vmem>>, vector<2x16x16x4xf32>
    %cst = arith.constant 0.000000e+00 : f32
    %1 = vector.broadcast %cst : f32 to vector<2x1x16x4xf32>
    %2 = tpu.concatenate %1, %0 in 1 : vector<2x1x16x4xf32>, vector<2x16x16x4xf32> -> vector<2x17x16x4xf32>
    %3 = vector.broadcast %cst : f32 to vector<2x1x16x4xf32>
    %4 = tpu.concatenate %2, %3 in 1 : vector<2x17x16x4xf32>, vector<2x1x16x4xf32> -> vector<2x18x16x4xf32>
    %5 = vector.broadcast %cst : f32 to vector<2x18x1x4xf32>
    %6 = tpu.concatenate %5, %4 in 2 : vector<2x18x1x4xf32>, vector<2x18x16x4xf32> -> vector<2x18x17x4xf32>
    %7 = vector.broadcast %cst : f32 to vector<2x18x1x4xf32>
    %8 = tpu.concatenate %6, %7 in 2 : vector<2x18x17x4xf32>, vector<2x18x1x4xf32> -> vector<2x18x18x4xf32>
    %9 = vector.extract_strided_slice %8 {offsets = [0, 0, 0, 0], sizes = [2, 16, 18, 4], strides = [1, 1, 1, 1]} : vector<2x18x18x4xf32> to vector<2x16x18x4xf32>
    %10 = vector.extract_strided_slice %8 {offsets = [0, 1, 0, 0], sizes = [2, 16, 18, 4], strides = [1, 1, 1, 1]} : vector<2x18x18x4xf32> to vector<2x16x18x4xf32>
    %11 = arith.addf %9, %10 : vector<2x16x18x4xf32>
    %12 = vector.extract_strided_slice %8 {offsets = [0, 2, 0, 0], sizes = [2, 16, 18, 4], strides = [1, 1, 1, 1]} : vector<2x18x18x4xf32> to vector<2x16x18x4xf32>
    %13 = arith.addf %11, %12 : vector<2x16x18x4xf32>
    %14 = vector.extract_strided_slice %13 {offsets = [0, 0, 0, 0], sizes = [2, 16, 16, 4], strides = [1, 1, 1, 1]} : vector<2x16x18x4xf32> to vector<2x16x16x4xf32>
    %15 = vector.extract_strided_slice %13 {offsets = [0, 0, 1, 0], sizes = [2, 16, 16, 4], strides = [1, 1, 1, 1]} : vector<2x16x18x4xf32> to vector<2x16x16x4xf32>
    %16 = arith.addf %14, %15 : vector<2x16x16x4xf32>
    %17 = vector.extract_strided_slice %13 {offsets = [0, 0, 2, 0], sizes = [2, 16, 16, 4], strides = [1, 1, 1, 1]} : vector<2x16x18x4xf32> to vector<2x16x16x4xf32>
    %18 = arith.addf %16, %17 : vector<2x16x16x4xf32>
    %c0_3 = arith.constant 0 : index
    %c0_4 = arith.constant 0 : index
    %c0_5 = arith.constant 0 : index
    %c0_6 = arith.constant 0 : index
    %19 = vector.load %arg2[%c0_3, %c0_4, %c0_5, %c0_6] : memref<1x16x16x1xf32, #tpu.memory_space<vmem>>, vector<1x16x16x1xf32>
    %20 = vector.broadcast %19 : vector<1x16x16x1xf32> to vector<2x16x16x4xf32>
    %21 = arith.mulf %18, %20 : vector<2x16x16x4xf32>
    %cst_7 = arith.constant dense<0.000000e+00> : vector<4xf32>
    %22 = vector.multi_reduction <add>, %21, %cst_7 [0, 1, 2] : vector<2x16x16x4xf32> to vector<4xf32>
    %23 = vector.shape_cast %22 : vector<4xf32> to vector<1x1x1x4xf32>
    %24 = arith.mulf %21, %21 : vector<2x16x16x4xf32>
    %cst_8 = arith.constant dense<0.000000e+00> : vector<4xf32>
    %25 = vector.multi_reduction <add>, %24, %cst_8 [0, 1, 2] : vector<2x16x16x4xf32> to vector<4xf32>
    %26 = vector.shape_cast %25 : vector<4xf32> to vector<1x1x1x4xf32>
    %cst_9 = arith.constant 0.001953125 : f32
    %27 = vector.broadcast %cst_9 : f32 to vector<1x1x1x4xf32>
    %28 = arith.mulf %23, %27 : vector<1x1x1x4xf32>
    %cst_10 = arith.constant 0.001953125 : f32
    %29 = vector.broadcast %cst_10 : f32 to vector<1x1x1x4xf32>
    %30 = arith.mulf %26, %29 : vector<1x1x1x4xf32>
    %31 = arith.mulf %28, %28 : vector<1x1x1x4xf32>
    %32 = arith.subf %30, %31 : vector<1x1x1x4xf32>
    %cst_11 = arith.constant 0.000000e+00 : f32
    %33 = vector.broadcast %cst_11 : f32 to vector<1x1x1x4xf32>
    %34 = arith.maximumf %32, %33 : vector<1x1x1x4xf32>
    %cst_12 = arith.constant 9.99999974E-6 : f32
    %35 = vector.broadcast %cst_12 : f32 to vector<1x1x1x4xf32>
    %36 = arith.addf %34, %35 : vector<1x1x1x4xf32>
    %37 = math.rsqrt %36 : vector<1x1x1x4xf32>
    %c0_13 = arith.constant 0 : index
    %c0_14 = arith.constant 0 : index
    %c0_15 = arith.constant 0 : index
    %c0_16 = arith.constant 0 : index
    %38 = vector.load %arg3[%c0_13, %c0_14, %c0_15, %c0_16] : memref<1x1x1x4xf32, #tpu.memory_space<vmem>>, vector<1x1x1x4xf32>
    %c0_17 = arith.constant 0 : index
    %c0_18 = arith.constant 0 : index
    %c0_19 = arith.constant 0 : index
    %c0_20 = arith.constant 0 : index
    %39 = vector.load %arg4[%c0_17, %c0_18, %c0_19, %c0_20] : memref<1x1x1x4xf32, #tpu.memory_space<vmem>>, vector<1x1x1x4xf32>
    %40 = arith.mulf %37, %38 : vector<1x1x1x4xf32>
    %41 = arith.mulf %28, %40 : vector<1x1x1x4xf32>
    %42 = arith.subf %39, %41 : vector<1x1x1x4xf32>
    %43 = vector.broadcast %40 : vector<1x1x1x4xf32> to vector<2x16x16x4xf32>
    %44 = arith.mulf %21, %43 : vector<2x16x16x4xf32>
    %45 = vector.broadcast %42 : vector<1x1x1x4xf32> to vector<2x16x16x4xf32>
    %46 = arith.addf %44, %45 : vector<2x16x16x4xf32>
    %c0_21 = arith.constant 0 : index
    %c0_22 = arith.constant 0 : index
    %c0_23 = arith.constant 0 : index
    %c0_24 = arith.constant 0 : index
    %47 = vector.load %arg5[%c0_21, %c0_22, %c0_23, %c0_24] : memref<2x16x16x4xf32, #tpu.memory_space<vmem>>, vector<2x16x16x4xf32>
    tpu.vector_store %arg5[%c0_21, %c0_22, %c0_23, %c0_24], %46 {strides = array<i32>} : memref<2x16x16x4xf32, #tpu.memory_space<vmem>>, vector<2x16x16x4xf32>,
    return
  }
  func.func @transform_0(%arg0: i32) -> (i32, i32, i32, i32) {
    %c0_i32 = arith.constant 0 : i32
    %c0_i32_0 = arith.constant 0 : i32
    %c0_i32_1 = arith.constant 0 : i32
    %c0_i32_2 = arith.constant 0 : i32
    return %c0_i32, %c0_i32_0, %c0_i32_1, %arg0 : i32, i32, i32, i32
  }
  func.func @transform_1(%arg0: i32) -> (i32, i32, i32, i32) {
    %c0_i32 = arith.constant 0 : i32
    %c0_i32_0 = arith.constant 0 : i32
    %c0_i32_1 = arith.constant 0 : i32
    %c0_i32_2 = arith.constant 0 : i32
    %c0_i32_3 = arith.constant 0 : i32
    return %c0_i32, %c0_i32_0, %c0_i32_1, %c0_i32_2 : i32, i32, i32, i32
  }
  func.func @transform_2(%arg0: i32) -> (i32, i32, i32, i32) {
    %c0_i32 = arith.constant 0 : i32
    %c0_i32_0 = arith.constant 0 : i32
    %c0_i32_1 = arith.constant 0 : i32
    %c0_i32_2 = arith.constant 0 : i32
    return %c0_i32, %c0_i32_0, %c0_i32_1, %arg0 : i32, i32, i32, i32
  }
  func.func @transform_3(%arg0: i32) -> (i32, i32, i32, i32) {
    %c0_i32 = arith.constant 0 : i32
    %c0_i32_0 = arith.constant 0 : i32
    %c0_i32_1 = arith.constant 0 : i32
    %c0_i32_2 = arith.constant 0 : i32
    return %c0_i32, %c0_i32_0, %c0_i32_1, %arg0 : i32, i32, i32, i32
  }
  func.func @transform_4(%arg0: i32) -> (i32, i32, i32, i32) {
    %c0_i32 = arith.constant 0 : i32
    %c0_i32_0 = arith.constant 0 : i32
    %c0_i32_1 = arith.constant 0 : i32
    %c0_i32_2 = arith.constant 0 : i32
    return %c0_i32, %c0_i32_0, %c0_i32_1, %arg0 : i32, i32, i32, i32
  }
}

</mosaic_0001>

<bundles_post_ra>
// kernel: tpu_custom_call.1
= control target key start
LH: loop header
LB: loop body
LE: loop exit
PB: predicated region body
PF: predicated region fallthrough
CT: control target
= control target key end

     0   :  { %v2086_v0 = vmov 0   ;;  %vm146_vm0 = vcmask 1040384   ;;  %v2087_v57 = vmov 0.0   ;;  %vm697_vm1 = vcmask 1046528   ;;  %s4792_s1 = inlined_call_operand.vmem [shape: f32[1,16,16,1], index: 1, kind: input, shape index: {}]   ;;  %s4793_s0 = inlined_call_operand.vmem [shape: f32[2,16,16,4], index: 0, kind: input, shape index: {}]   ;;  %s4794_s2 = inlined_call_operand.vmem [shape: f32[1,1,1,4], index: 2, kind: input, shape index: {}]   ;;  %s4795_s3 = inlined_call_operand.vmem [shape: f32[1,1,1,4], index: 3, kind: input, shape index: {}]   ;;  %s4796_s4 = inlined_call_operand.vmem [shape: f32[2,16,16,4], index: 4, kind: output, shape index: {}]  }
   0x1   :  { %2083 = vset.pattern.permute.xlu1 %v2086_v0  ;;  %2082 = vset.pattern.permute.xlu0 %v2086_v0  ;;  %v1277_v1 = vld [vmem:[%s4792_s1 + $0x10] sm:$0xff]  ;;  %v1275_v2 = vld [vmem:[%s4792_s1] sm:$0xff]  ;;  %v1278_v3 = vld [vmem:[%s4792_s1 + $0x18] sm:$0xff]  ;;  %v2260_v58 = vrot.slane %v2087_v57, 7  ;;  %vm986_vm2 = vcmask 1045504   ;;  %vm1531_vm3 = vcmask 31744  }
   0x2   :  { %1319 = vperm.xlu1 %2083, %v1277_v1   ;;  %1309 = vperm.xlu0 %2082, %v1275_v2   ;;  %v1276_v4 = vld [vmem:[%s4792_s1 + $0x8] sm:$0xff]  ;;  %v1279_v6 = vld [vmem:[%s4792_s1 + $0x20] sm:$0xff]  ;;  %v1282_v7 = vld [vmem:[%s4792_s1 + $0x38] sm:$0xff] }
   0x3   :  { %v1280_v5 = vld [vmem:[%s4792_s1 + $0x28] sm:$0xff]  ;;  %v1281_v8 = vld [vmem:[%s4792_s1 + $0x30] sm:$0xff]  ;;  %v1283_v10 = vld [vmem:[%s4792_s1 + $0x40] sm:$0xff]  ;;  %4873 = vst [vmem:[#allocation2_spill] sm:$0xff] %v2260_v58 }
   0x4   :  { %v1284_v9 = vld [vmem:[%s4792_s1 + $0x48] sm:$0xff]  ;;  %v1286_v11 = vld [vmem:[%s4792_s1 + $0x58] sm:$0xff]  ;;  %v1285_v12 = vld [vmem:[%s4792_s1 + $0x50] sm:$0xff] }
   0x5   :  { %v1288_v13 = vld [vmem:[%s4792_s1 + $0x68] sm:$0xff]  ;;  %v1287_v14 = vld [vmem:[%s4792_s1 + $0x60] sm:$0xff]  ;;  %v1290_v15 = vld [vmem:[%s4792_s1 + $0x78] sm:$0xff] }
   0x6   :  { %1324 = vperm.xlu1 %2083, %v1278_v3   ;;  %1314 = vperm.xlu0 %2082, %v1276_v4   ;;  %v1289_v16 = vld [vmem:[%s4792_s1 + $0x70] sm:$0xff]  ;;  %v1292_v17 = vld [vmem:[%s4792_s1 + $0x88] sm:$0xff]  ;;  %v1291_v18 = vld [vmem:[%s4792_s1 + $0x80] sm:$0xff] }
   0x7   :  { %v1294_v19 = vld [vmem:[%s4792_s1 + $0x98] sm:$0xff]  ;;  %v1293_v20 = vld [vmem:[%s4792_s1 + $0x90] sm:$0xff]  ;;  %v1296_v21 = vld [vmem:[%s4792_s1 + $0xa8] sm:$0xff] }
   0x8   :  { %v1295_v22 = vld [vmem:[%s4792_s1 + $0xa0] sm:$0xff]  ;;  %v1298_v23 = vld [vmem:[%s4792_s1 + $0xb8] sm:$0xff]  ;;  %v1297_v24 = vld [vmem:[%s4792_s1 + $0xb0] sm:$0xff] }
   0x9   :  { %v1300_v25 = vld [vmem:[%s4792_s1 + $0xc8] sm:$0xff]  ;;  %v1299_v26 = vld [vmem:[%s4792_s1 + $0xc0] sm:$0xff]  ;;  %v1302_v27 = vld [vmem:[%s4792_s1 + $0xd8] sm:$0xff] }
   0xa   :  { %1334 = vperm.xlu1 %2083, %v1280_v5   ;;  %1329 = vperm.xlu0 %2082, %v1279_v6   ;;  %v1301_v28 = vld [vmem:[%s4792_s1 + $0xd0] sm:$0xff]  ;;  %v17_v29 = vld [vmem:[%s4793_s0] sm:$0xff]  ;;  %v2203_v30 = vld [vmem:[%s4793_s0 + $0x8] sm:$0xff] }
   0xb   :  { %v19_v31 = vld [vmem:[%s4793_s0 + $0x10] sm:$0xff]  ;;  %v2211_v32 = vld [vmem:[%s4793_s0 + $0x18] sm:$0xff]  ;;  %v1304_v33 = vld [vmem:[%s4792_s1 + $0xe8] sm:$0xff]  ;;  %v149_v41 = vrot.slane %v17_v29, 7  ;;  %v150_v42 = vrot.slane %v2203_v30, 7 }
   0xc   :  { %v1303_v34 = vld [vmem:[%s4792_s1 + $0xe0] sm:$0xff]  ;;  %v2225_v36 = vld [vmem:[%s4793_s0 + $0x28] sm:$0xff]  ;;  %v51_v39 = vld [vmem:[%s4793_s0 + $0x110] sm:$0xff]  ;;  %v152_v43 = vrot.slane %v19_v31, 7  ;;  %v153_v44 = vrot.slane %v2211_v32, 7 }
   0xd   :  { %v21_v35 = vld [vmem:[%s4793_s0 + $0x20] sm:$0xff]  ;;  %v50_v38 = vld [vmem:[%s4793_s0 + $0x108] sm:$0xff]  ;;  %v52_v40 = vld [vmem:[%s4793_s0 + $0x118] sm:$0xff]  ;;  %v156_v50 = vrot.slane %v2225_v36, 7  ;;  %v200_v53 = vrot.slane %v51_v39, 7  ;;  %v151_v55 = vsel %vm146_vm0, %v149_v41, %v150_v42  ;;  %v344_v61 = vsel %vm146_vm0, 0.0, %v149_v41 }
   0xe   :  { %1344 = vperm.xlu1 %2083, %v1282_v7   ;;  %1339 = vperm.xlu0 %2082, %v1281_v8   ;;  %v49_v37 = vld [vmem:[%s4793_s0 + $0x100] sm:$0xff]  ;;  %v1306_v45 = vld [vmem:[%s4792_s1 + $0xf8] sm:$0xff]  ;;  %v1305_v46 = vld [vmem:[%s4792_s1 + $0xf0] sm:$0xff]  ;;  %v155_v49 = vrot.slane %v21_v35, 7  ;;  %v198_v52 = vrot.slane %v50_v38, 7  ;;  %v201_v54 = vrot.slane %v52_v40, 7  ;;  %v2258_v56 = vsel %vm146_vm0, %v152_v43, %v153_v44 }
   0xf   :  { %v53_v47 = vld [vmem:[%s4793_s0 + $0x120] sm:$0xff]  ;;  %v2253_v48 = vld [vmem:[%s4793_s0 + $0x128] sm:$0xff]  ;;  %v197_v51 = vrot.slane %v49_v37, 7  ;;  %v2265_v62 = vsel %vm146_vm0, 0.0, %v152_v43  ;;  %v413_v2 = vadd.f32 %v2258_v56, %v151_v55  ;;  %v2281_v6 = vsel %vm146_vm0, 0.0, %v200_v53 }
  0x10   :  { %v203_v59 = vrot.slane %v53_v47, 7  ;;  %v204_v60 = vrot.slane %v2253_v48, 7  ;;  %v2268_v63 = vsel %vm146_vm0, %v155_v49, %v156_v50  ;;  %v412_v1 = vadd.f32 %v2265_v62, %v344_v61 }
  0x11   :  { %v199_v0 = vsel %vm146_vm0, %v197_v51, %v198_v52  ;;  %v2274_v3 = vsel %vm146_vm0, %v200_v53, %v201_v54  ;;  %v2277_v4 = vsel %vm146_vm0, 0.0, %v155_v49  ;;  %v360_v5 = vsel %vm146_vm0, 0.0, %v197_v51 }
  0x12   :  { %1354 = vperm.xlu1 %2083, %v1284_v9   ;;  %1349 = vperm.xlu0 %2082, %v1283_v10   ;;  %v460_v7 = vadd.f32 %v2281_v6, %v360_v5  ;;  %v461_v8 = vadd.f32 %v2274_v3, %v199_v0  ;;  %v2287_v9 = vsel %vm146_vm0, 0.0, %v2260_v58  ;;  %v2290_v10 = vsel %vm146_vm0, %v203_v59, %v204_v60 }
  0x13   :  { %4874 = vst [vmem:[#allocation3_spill] sm:$0xff] %v2287_v9  ;;  %v393_v29 = vsel %vm146_vm0, %v198_v52, 0.0  ;;  %v394_v30 = vsel %vm146_vm0, %v201_v54, 0.0  ;;  %v2330_v37 = vsel %vm146_vm0, %v2260_v58, 0.0  ;;  %v23_v52 = vld [vmem:[%s4793_s0 + $0x30] sm:$0xff] }
  0x14   :  { %4875 = vst [vmem:[#allocation4_spill] sm:$0xff] %v2330_v37  ;;  %v462_v41 = vadd.f32 %v394_v30, %v393_v29  ;;  %v459_v57 = vadd.f32 %v393_v29, %v2330_v37  ;;  %v416_v29 = vadd.f32 %v2268_v63, %v2258_v56 }
  0x16   :  { %1364 = vperm.xlu1 %2083, %v1286_v11   ;;  %1359 = vperm.xlu0 %2082, %v1285_v12   ;;  %v2293_v11 = vsel %vm146_vm0, 0.0, %v203_v59  ;;  %v508_v12 = vadd.f32 %v412_v1, %v2277_v4 }
  0x1a   :  { %1374 = vperm.xlu1 %2083, %v1288_v13   ;;  %1369 = vperm.xlu0 %2082, %v1287_v14   ;;  %v2297_v13 = vadd.f32 %v413_v2, %v2268_v63  ;;  %v409_v14 = vadd.f32 %v344_v61, %v2287_v9  ;;  %v55_v2 = vld [vmem:[%s4793_s0 + $0x130] sm:$0xff] }
  0x1c   :  { %v993_v32 = vrot.slane %v2297_v13, 2 }
  0x1e   :  { %1384 = vperm.xlu1 %2083, %v1290_v15   ;;  %1379 = vperm.xlu0 %2082, %v1289_v16   ;;  %v556_v15 = vadd.f32 %v460_v7, %v2293_v11  ;;  %v2302_v16 = vadd.f32 %v461_v8, %v2290_v10 }
  0x20   :  { %v1072_v35 = vrot.slane %v556_v15, 2  ;;  %v1073_v36 = vrot.slane %v2302_v16, 2 }
  0x22   :  { %1394 = vperm.xlu1 %2083, %v1292_v17   ;;  %1389 = vperm.xlu0 %2082, %v1291_v18   ;;  %v410_v17 = vadd.f32 %v151_v55, %v2260_v58  ;;  %v703_v18 = vrot.slane %v508_v12, 1  ;;  %v1074_v53 = vsel %vm986_vm2, %v1072_v35, %v1073_v36 }
  0x26   :  { %1404 = vperm.xlu1 %2083, %v1294_v19   ;;  %1399 = vperm.xlu0 %2082, %v1293_v20   ;;  %v704_v19 = vrot.slane %v2297_v13, 1  ;;  %v457_v20 = vadd.f32 %v360_v5, %v2287_v9  ;;  %v158_v5 = vrot.slane %v23_v52, 7 }
  0x28   :  { %v705_v31 = vsel %vm697_vm1, %v703_v18, %v704_v19 }
  0x2a   :  { %1414 = vperm.xlu1 %2083, %v1296_v21   ;;  %1409 = vperm.xlu0 %2082, %v1295_v22   ;;  %v458_v21 = vadd.f32 %v199_v0, %v2260_v58  ;;  %v2309_v22 = vadd.f32 %v409_v14, %v2265_v62 }
  0x2c   :  { %v698_v39 = vrot.slane %v2309_v22, 1  ;;  %v987_v61 = vrot.slane %v2309_v22, 2 }
  0x2e   :  { %1424 = vperm.xlu1 %2083, %v1298_v23   ;;  %1419 = vperm.xlu0 %2082, %v1297_v24   ;;  %v783_v23 = vrot.slane %v556_v15, 1  ;;  %v784_v24 = vrot.slane %v2302_v16, 1 }
  0x30   :  { %v785_v38 = vsel %vm697_vm1, %v783_v23, %v784_v24  ;;  %v555_v23 = vadd.f32 %v459_v57, %v394_v30  ;;  %v415_v57 = vadd.f32 %v2277_v4, %v2265_v62 }
  0x31   :  { %v956_v49 = vadd.f32 %v785_v38, %v556_v15 }
  0x32   :  { %1434 = vperm.xlu1 %2083, %v1300_v25   ;;  %1429 = vperm.xlu0 %2082, %v1299_v26   ;;  %v2313_v25 = vadd.f32 %v410_v17, %v2258_v56  ;;  %v377_v26 = vsel %vm146_vm0, %v150_v42, 0.0  ;;  %v924_v42 = vadd.f32 %v705_v31, %v508_v12  ;;  %v56_v17 = vld [vmem:[%s4793_s0 + $0x138] sm:$0xff] }
  0x33   :  { %v411_v51 = vadd.f32 %v377_v26, %v2330_v37  ;;  %v2369_v8 = vadd.f32 %v1074_v53, %v956_v49  ;;  %v464_v49 = vadd.f32 %v2290_v10, %v2274_v3  ;;  %v1070_v53 = vrot.slane %v555_v23, 2 }
  0x34   :  { %v699_v43 = vrot.slane %v2313_v25, 1  ;;  %v988_v1 = vrot.slane %v2313_v25, 2 }
  0x36   :  { %1444 = vperm.xlu1 %2083, %v1302_v27   ;;  %1439 = vperm.xlu0 %2082, %v1301_v28   ;;  %v992_v27 = vrot.slane %v508_v12, 2  ;;  %v378_v28 = vsel %vm146_vm0, %v153_v44, 0.0  ;;  %v2338_v44 = vsel %vm146_vm0, %v156_v50, 0.0  ;;  %v24_v50 = vld [vmem:[%s4793_s0 + $0x38] sm:$0xff] }
  0x37   :  { %v414_v40 = vadd.f32 %v378_v28, %v377_v26  ;;  %v159_v7 = vrot.slane %v24_v50, 7  ;;  %v507_v15 = vadd.f32 %v411_v51, %v378_v28  ;;  %v417_v31 = vadd.f32 %v2338_v44, %v378_v28 }
  0x39   :  { %v510_v54 = vadd.f32 %v414_v40, %v2338_v44  ;;  %v2380_v38 = vsel %vm146_vm0, %v158_v5, %v159_v7  ;;  %v2383_v40 = vsel %vm146_vm0, %v159_v7, 0.0 }
  0x3a   :  { %1454 = vperm.xlu1 %2083, %v1304_v33   ;;  %1449 = vperm.xlu0 %2082, %v1303_v34   ;;  %v553_v33 = vadd.f32 %v457_v20, %v2281_v6  ;;  %v2325_v34 = vadd.f32 %v458_v21, %v2274_v3  ;;  %v2397_v52 = vadd.f32 %v416_v29, %v2380_v38 }
  0x3b   :  { %v706_v20 = vrot.slane %v510_v54, 1  ;;  %v995_v35 = vrot.slane %v510_v54, 2  ;;  %v513_v50 = vadd.f32 %v417_v31, %v2383_v40 }
  0x3c   :  { %v778_v47 = vrot.slane %v553_v33, 1  ;;  %v779_v48 = vrot.slane %v2325_v34, 1  ;;  %v1067_v12 = vrot.slane %v553_v33, 2  ;;  %v1068_v14 = vrot.slane %v2325_v34, 2 }
  0x3d   :  { %v707_v56 = vsel %vm697_vm1, %v704_v19, %v706_v20  ;;  %v996_v19 = vsel %vm986_vm2, %v993_v32, %v995_v35  ;;  %v711_v7 = vrot.slane %v513_v50, 1 }
  0x3e   :  { %1464 = vperm.xlu1 %2083, %v1306_v45   ;;  %1459 = vperm.xlu0 %2082, %v1305_v46   ;;  %v2341_v45 = vsel %vm146_vm0, %v204_v60, 0.0  ;;  %v994_v46 = vsel %vm986_vm2, %v992_v27, %v993_v32  ;;  %v700_v60 = vsel %vm697_vm1, %v698_v39, %v699_v43  ;;  %v780_v0 = vsel %vm697_vm1, %v778_v47, %v779_v48 }
  0x3f   :  { %v558_v55 = vadd.f32 %v462_v41, %v2341_v45  ;;  %v2360_v59 = vadd.f32 %v994_v46, %v924_v42  ;;  %v922_v18 = vadd.f32 %v700_v60, %v2309_v22  ;;  %v954_v26 = vadd.f32 %v780_v0, %v553_v33 }
  0x40   :  { %v206_v27 = vrot.slane %v55_v2, 7  ;;  %v207_v39 = vrot.slane %v56_v17, 7  ;;  %v989_v22 = vsel %vm986_vm2, %v987_v61, %v988_v1  ;;  %v1069_v41 = vsel %vm986_vm2, %v1067_v12, %v1068_v14 }
  0x41   :  { %v786_v21 = vrot.slane %v558_v55, 1  ;;  %v1075_v42 = vrot.slane %v558_v55, 2  ;;  %v701_v33 = vrot.slane %v507_v15, 1  ;;  %v781_v46 = vrot.slane %v555_v23, 1 }
  0x42   :  { %v990_v47 = vrot.slane %v507_v15, 2  ;;  %v465_v51 = vadd.f32 %v2341_v45, %v394_v30  ;;  %v2404_v54 = vsel %vm146_vm0, %v206_v27, %v207_v39  ;;  %v925_v3 = vadd.f32 %v707_v56, %v2297_v13 }
  0x43   :  { %v787_v28 = vsel %vm697_vm1, %v784_v24, %v786_v21  ;;  %v2407_v24 = vsel %vm146_vm0, %v207_v39, 0.0  ;;  %v702_v55 = vsel %vm697_vm1, %v699_v43, %v701_v33  ;;  %v782_v60 = vsel %vm697_vm1, %v779_v48, %v781_v46 }
  0x44   :  { %v957_v30 = vadd.f32 %v787_v28, %v2302_v16  ;;  %v2416_v32 = vsel %vm146_vm0, 0.0, %v158_v5  ;;  %v2419_v61 = vsel %vm146_vm0, 0.0, %v206_v27  ;;  %v463_v0 = vadd.f32 %v2293_v11, %v2281_v6  ;;  %v25_v6 = vld [vmem:[%s4793_s0 + $0x40] sm:$0xff]  ;;  %v26_v16 = vld [vmem:[%s4793_s0 + $0x48] sm:$0xff] }
  0x45   :  { %v2424_v13 = vadd.f32 %v464_v49, %v2404_v54  ;;  %v561_v2 = vadd.f32 %v465_v51, %v2407_v24  ;;  %v709_v43 = vrot.slane %v2397_v52, 1  ;;  %v2428_v62 = vadd.f32 %v989_v22, %v922_v18 }
  0x46   :  { %v2430_v48 = vadd.f32 %v1069_v41, %v954_v26  ;;  %v1076_v5 = vsel %vm986_vm2, %v1073_v36, %v1075_v42  ;;  %v923_v12 = vadd.f32 %v702_v55, %v2313_v25  ;;  %v2439_v15 = vadd.f32 %v996_v19, %v925_v3  ;;  %v57_v25 = vld [vmem:[%s4793_s0 + $0x140] sm:$0xff]  ;;  %v58_v36 = vld [vmem:[%s4793_s0 + $0x148] sm:$0xff] }
  0x47   :  { %v991_v17 = vsel %vm986_vm2, %v988_v1, %v990_v47  ;;  %v1071_v20 = vsel %vm986_vm2, %v1068_v14, %v1070_v53  ;;  %v511_v18 = vadd.f32 %v415_v57, %v2416_v32  ;;  %v955_v21 = vadd.f32 %v782_v60, %v2325_v34 }
  0x48   :  { %v998_v1 = vrot.slane %v2397_v52, 2  ;;  %v1000_v23 = vrot.slane %v513_v50, 2  ;;  %v559_v14 = vadd.f32 %v463_v0, %v2419_v61  ;;  %v2456_v26 = vadd.f32 %v1076_v5, %v957_v30  ;;  %v27_v5 = vld [vmem:[%s4793_s0 + $0x50] sm:$0xff] }
  0x49   :  { %v712_v27 = vsel %vm697_vm1, %v709_v43, %v711_v7  ;;  %v789_v29 = vrot.slane %v2424_v13, 1  ;;  %v791_v31 = vrot.slane %v561_v2, 1  ;;  %v161_v35 = vrot.slane %v25_v6, 7 }
  0x4a   :  { %v162_v39 = vrot.slane %v26_v16, 7  ;;  %v209_v22 = vrot.slane %v57_v25, 7  ;;  %v210_v41 = vrot.slane %v58_v36, 7  ;;  %v2460_v42 = vadd.f32 %v991_v17, %v923_v12  ;;  %v2512_v17 = vld [vmem:[%s4793_s0 + $0x150] sm:$0xff] }
  0x4b   :  { %v1078_v34 = vrot.slane %v2424_v13, 2  ;;  %v1080_v33 = vrot.slane %v561_v2, 2  ;;  %v708_v56 = vrot.slane %v511_v18, 1  ;;  %v2463_v28 = vadd.f32 %v1071_v20, %v955_v21  ;;  %v60_v20 = vld [vmem:[%s4793_s0 + $0x158] sm:$0xff] }
  0x4c   :  { %v927_v46 = vadd.f32 %v712_v27, %v2397_v52  ;;  %v1001_v47 = vsel %vm986_vm2, %v998_v1, %v1000_v23  ;;  %v788_v49 = vrot.slane %v559_v14, 1  ;;  %v792_v51 = vsel %vm697_vm1, %v789_v29, %v791_v31 }
  0x4d   :  { %v419_v50 = vadd.f32 %v2380_v38, %v2268_v63  ;;  %v420_v19 = vadd.f32 %v2383_v40, %v2338_v44  ;;  %v467_v53 = vadd.f32 %v2404_v54, %v2290_v10  ;;  %v2475_v3 = vsel %vm146_vm0, %v161_v35, %v162_v39 }
  0x4e   :  { %v2478_v30 = vsel %vm146_vm0, %v209_v22, %v210_v41  ;;  %v2481_v52 = vsel %vm146_vm0, %v162_v39, 0.0  ;;  %v468_v55 = vadd.f32 %v2407_v24, %v2341_v45  ;;  %v1081_v63 = vsel %vm986_vm2, %v1078_v34, %v1080_v33  ;;  %v28_v45 = vld [vmem:[%s4793_s0 + $0x58] sm:$0xff] }
  0x4f   :  { %v710_v57 = vsel %vm697_vm1, %v708_v56, %v709_v43  ;;  %v997_v44 = vrot.slane %v511_v18, 2  ;;  %v2488_v60 = vsel %vm146_vm0, %v210_v41, 0.0  ;;  %v959_v10 = vadd.f32 %v792_v51, %v2424_v13 }
  0x50   :  { %v2491_v0 = vadd.f32 %v1001_v47, %v927_v46  ;;  %v790_v2 = vsel %vm697_vm1, %v788_v49, %v789_v29  ;;  %v1077_v7 = vrot.slane %v559_v14, 2  ;;  %v2501_v43 = vadd.f32 %v419_v50, %v2475_v3 }
  0x51   :  { %v516_v12 = vadd.f32 %v420_v19, %v2481_v52  ;;  %v2505_v13 = vadd.f32 %v467_v53, %v2478_v30  ;;  %v418_v6 = vadd.f32 %v2416_v32, %v2277_v4  ;;  %v926_v16 = vadd.f32 %v710_v57, %v511_v18 }
  0x52   :  { %v564_v25 = vadd.f32 %v468_v55, %v2488_v60  ;;  %v2519_v36 = vsel %vm146_vm0, 0.0, %v161_v35  ;;  %v466_v21 = vadd.f32 %v2419_v61, %v2293_v11  ;;  %v999_v4 = vsel %vm986_vm2, %v997_v44, %v998_v1 }
  0x53   :  { %v2525_v23 = vsel %vm146_vm0, 0.0, %v209_v22  ;;  %v164_v27 = vrot.slane %v27_v5, 7  ;;  %v165_v29 = vrot.slane %v28_v45, 7  ;;  %v958_v31 = vadd.f32 %v790_v2, %v559_v14 }
  0x54   :  { %v1079_v39 = vsel %vm986_vm2, %v1077_v7, %v1078_v34  ;;  %v212_v18 = vrot.slane %v2512_v17, 7  ;;  %v213_v41 = vrot.slane %v60_v20, 7  ;;  %v714_v33 = vrot.slane %v2501_v43, 1 }
  0x55   :  { %v716_v35 = vrot.slane %v516_v12, 1  ;;  %v794_v56 = vrot.slane %v2505_v13, 1  ;;  %v514_v11 = vadd.f32 %v418_v6, %v2519_v36  ;;  %v796_v46 = vrot.slane %v564_v25, 1 }
  0x56   :  { %v562_v1 = vadd.f32 %v466_v21, %v2525_v23  ;;  %v422_v22 = vadd.f32 %v2475_v3, %v2380_v38  ;;  %v423_v14 = vadd.f32 %v2481_v52, %v2383_v40  ;;  %v2538_v34 = vsel %vm146_vm0, %v164_v27, %v165_v29 }
  0x57   :  { %v2541_v47 = vsel %vm146_vm0, %v165_v29, 0.0  ;;  %v470_v49 = vadd.f32 %v2478_v30, %v2404_v54  ;;  %v471_v51 = vadd.f32 %v2488_v60, %v2407_v24  ;;  %v1003_v50 = vrot.slane %v2501_v43, 2 }
  0x58   :  { %v1005_v19 = vrot.slane %v516_v12, 2  ;;  %v2549_v38 = vsel %vm146_vm0, %v212_v18, %v213_v41  ;;  %v2552_v40 = vsel %vm146_vm0, %v213_v41, 0.0  ;;  %v717_v53 = vsel %vm697_vm1, %v714_v33, %v716_v35 }
  0x59   :  { %v1083_v55 = vrot.slane %v2505_v13, 2  ;;  %v1085_v57 = vrot.slane %v564_v25, 2  ;;  %v713_v44 = vrot.slane %v514_v11, 1  ;;  %v2556_v2 = vadd.f32 %v1081_v63, %v959_v10 }
  0x5a   :  { %v2558_v54 = vadd.f32 %v999_v4, %v926_v16  ;;  %v2561_v24 = vadd.f32 %v422_v22, %v2538_v34  ;;  %v519_v7 = vadd.f32 %v423_v14, %v2541_v47  ;;  %v797_v5 = vsel %vm697_vm1, %v794_v56, %v796_v46 }
  0x5b   :  { %v793_v45 = vrot.slane %v562_v1, 1  ;;  %v2566_v12 = vadd.f32 %v470_v49, %v2549_v38  ;;  %v567_v6 = vadd.f32 %v471_v51, %v2552_v40  ;;  %v2569_v17 = vadd.f32 %v1079_v39, %v958_v31  ;;  %v30_v39 = vld [vmem:[%s4793_s0 + $0x68] sm:$0xff]  ;;  %v61_v51 = vld [vmem:[%s4793_s0 + $0x160] sm:$0xff] }
  0x5c   :  { %v929_v63 = vadd.f32 %v717_v53, %v2501_v43  ;;  %v1006_v10 = vsel %vm986_vm2, %v1003_v50, %v1005_v19  ;;  %v1002_v20 = vrot.slane %v514_v11, 2  ;;  %v1086_v16 = vsel %vm986_vm2, %v1083_v55, %v1085_v57  ;;  %v29_v43 = vld [vmem:[%s4793_s0 + $0x60] sm:$0xff] }
  0x5d   :  { %v715_v25 = vsel %vm697_vm1, %v713_v44, %v714_v33  ;;  %v1082_v21 = vrot.slane %v562_v1, 2  ;;  %v421_v4 = vadd.f32 %v2519_v36, %v2416_v32  ;;  %v961_v29 = vadd.f32 %v797_v5, %v2505_v13 }
  0x5e   :  { %v719_v41 = vrot.slane %v2561_v24, 1  ;;  %v721_v35 = vrot.slane %v519_v7, 1  ;;  %v2580_v31 = vsel %vm146_vm0, 0.0, %v164_v27  ;;  %v795_v33 = vsel %vm697_vm1, %v793_v45, %v794_v56  ;;  %v62_v56 = vld [vmem:[%s4793_s0 + $0x168] sm:$0xff] }
  0x5f   :  { %v799_v32 = vrot.slane %v2566_v12, 1  ;;  %v801_v46 = vrot.slane %v567_v6, 1  ;;  %v469_v13 = vadd.f32 %v2525_v23, %v2419_v61  ;;  %v2592_v22 = vadd.f32 %v1006_v10, %v929_v63 }
  0x60   :  { %v928_v27 = vadd.f32 %v715_v25, %v514_v11  ;;  %v1004_v14 = vsel %vm986_vm2, %v1002_v20, %v1003_v50  ;;  %v2596_v49 = vsel %vm146_vm0, 0.0, %v212_v18  ;;  %v1084_v19 = vsel %vm986_vm2, %v1082_v21, %v1083_v55 }
  0x61   :  { %v517_v61 = vadd.f32 %v421_v4, %v2580_v31  ;;  %v167_v53 = vrot.slane %v29_v43, 7  ;;  %v168_v57 = vrot.slane %v30_v39, 7  ;;  %v960_v11 = vadd.f32 %v795_v33, %v562_v1 }
  0x62   :  { %v722_v50 = vsel %vm697_vm1, %v719_v41, %v721_v35  ;;  %v1008_v18 = vrot.slane %v2561_v24, 2  ;;  %v1010_v44 = vrot.slane %v519_v7, 2  ;;  %v802_v5 = vsel %vm697_vm1, %v799_v32, %v801_v46 }
  0x63   :  { %v565_v45 = vadd.f32 %v469_v13, %v2596_v49  ;;  %v215_v63 = vrot.slane %v61_v51, 7  ;;  %v216_v10 = vrot.slane %v62_v56, 7  ;;  %v1088_v20 = vrot.slane %v2566_v12, 2 }
  0x64   :  { %v1090_v25 = vrot.slane %v567_v6, 2  ;;  %v425_v55 = vadd.f32 %v2538_v34, %v2475_v3  ;;  %v426_v1 = vadd.f32 %v2541_v47, %v2481_v52  ;;  %v931_v21 = vadd.f32 %v722_v50, %v2561_v24 }
  0x65   :  { %v718_v4 = vrot.slane %v517_v61, 1  ;;  %v2617_v7 = vsel %vm146_vm0, %v167_v53, %v168_v57  ;;  %v2620_v35 = vsel %vm146_vm0, %v168_v57, 0.0  ;;  %v963_v43 = vadd.f32 %v802_v5, %v2566_v12 }
  0x66   :  { %v1011_v39 = vsel %vm986_vm2, %v1008_v18, %v1010_v44  ;;  %v473_v6 = vadd.f32 %v2549_v38, %v2478_v30  ;;  %v474_v3 = vadd.f32 %v2552_v40, %v2488_v60  ;;  %v798_v52 = vrot.slane %v565_v45, 1 }
  0x67   :  { %v1007_v33 = vrot.slane %v517_v61, 2  ;;  %v2629_v24 = vsel %vm146_vm0, %v215_v63, %v216_v10  ;;  %v2632_v46 = vsel %vm146_vm0, %v216_v10, 0.0  ;;  %v2634_v13 = vadd.f32 %v1086_v16, %v961_v29 }
  0x68   :  { %v1091_v12 = vsel %vm986_vm2, %v1088_v20, %v1090_v25  ;;  %v2638_v51 = vadd.f32 %v425_v55, %v2617_v7  ;;  %v522_v30 = vadd.f32 %v426_v1, %v2620_v35  ;;  %v2641_v56 = vadd.f32 %v1004_v14, %v928_v27  ;;  %v31_v27 = vld [vmem:[%s4793_s0 + $0x70] sm:$0xff]  ;;  %v32_v14 = vld [vmem:[%s4793_s0 + $0x78] sm:$0xff] }
  0x69   :  { %4876 = vst [vmem:[#allocation5_spill] sm:$0xff] %v2634_v13  ;;  %v2643_v60 = vadd.f32 %v1084_v19, %v960_v11  ;;  %v2645_v57 = vadd.f32 %v1011_v39, %v931_v21  ;;  %v720_v50 = vsel %vm697_vm1, %v718_v4, %v719_v41  ;;  %v1087_v44 = vrot.slane %v565_v45, 2  ;;  %v63_v21 = vld [vmem:[%s4793_s0 + $0x170] sm:$0xff] }
  0x6a   :  { %v2649_v5 = vadd.f32 %v473_v6, %v2629_v24  ;;  %v570_v16 = vadd.f32 %v474_v3, %v2632_v46  ;;  %v424_v29 = vadd.f32 %v2580_v31, %v2519_v36  ;;  %v2660_v19 = vadd.f32 %v1091_v12, %v963_v43 }
  0x6b   :  { %4877 = vst [vmem:[#allocation6_spill] sm:$0xff] %v2643_v60  ;;  %v800_v41 = vsel %vm697_vm1, %v798_v52, %v799_v32  ;;  %v1009_v11 = vsel %vm986_vm2, %v1007_v33, %v1008_v18  ;;  %v2665_v10 = vsel %vm146_vm0, 0.0, %v167_v53  ;;  %v930_v25 = vadd.f32 %v720_v50, %v517_v61  ;;  %v64_v32 = vld [vmem:[%s4793_s0 + $0x178] sm:$0xff] }
  0x6c   :  { %4878 = vst [vmem:[#allocation7_spill] sm:$0xff] %v2660_v19  ;;  %v724_v36 = vrot.slane %v2638_v51, 1  ;;  %v726_v55 = vrot.slane %v522_v30, 1  ;;  %v2669_v1 = vsel %vm146_vm0, 0.0, %v215_v63  ;;  %v1013_v18 = vrot.slane %v2638_v51, 2 }
  0x6d   :  { %v472_v53 = vadd.f32 %v2596_v49, %v2525_v23  ;;  %v170_v61 = vrot.slane %v31_v27, 7  ;;  %v171_v4 = vrot.slane %v32_v14, 7  ;;  %v804_v43 = vrot.slane %v2649_v5, 1 }
  0x6e   :  { %v806_v39 = vrot.slane %v570_v16, 1  ;;  %v1015_v63 = vrot.slane %v522_v30, 2  ;;  %v520_v6 = vadd.f32 %v424_v29, %v2665_v10  ;;  %v962_v3 = vadd.f32 %v800_v41, %v565_v45 }
  0x6f   :  { %v1089_v52 = vsel %vm986_vm2, %v1087_v44, %v1088_v20  ;;  %v218_v33 = vrot.slane %v63_v21, 7  ;;  %v219_v12 = vrot.slane %v64_v32, 7  ;;  %v2683_v50 = vadd.f32 %v1009_v11, %v930_v25 }
  0x70   :  { %v727_v9 = vsel %vm697_vm1, %v724_v36, %v726_v55  ;;  %v428_v23 = vadd.f32 %v2617_v7, %v2538_v34  ;;  %v429_v27 = vadd.f32 %v2620_v35, %v2541_v47  ;;  %v1093_v14 = vrot.slane %v2649_v5, 2 }
  0x71   :  { %v568_v30 = vadd.f32 %v472_v53, %v2669_v1  ;;  %v2693_v45 = vsel %vm146_vm0, %v170_v61, %v171_v4  ;;  %v2696_v20 = vsel %vm146_vm0, %v171_v4, 0.0  ;;  %v807_v44 = vsel %vm697_vm1, %v804_v43, %v806_v39 }
  0x72   :  { %v1016_v29 = vsel %vm986_vm2, %v1013_v18, %v1015_v63  ;;  %v1095_v41 = vrot.slane %v570_v16, 2  ;;  %v723_v11 = vrot.slane %v520_v6, 1  ;;  %v933_v34 = vadd.f32 %v727_v9, %v2638_v51 }
  0x73   :  { %v2702_v47 = vsel %vm146_vm0, %v218_v33, %v219_v12  ;;  %v476_v25 = vadd.f32 %v2629_v24, %v2549_v38  ;;  %v477_v55 = vadd.f32 %v2632_v46, %v2552_v40  ;;  %v2709_v21 = vsel %vm146_vm0, %v219_v12, 0.0 }
  0x74   :  { %v2712_v32 = vadd.f32 %v428_v23, %v2693_v45  ;;  %v525_v16 = vadd.f32 %v429_v27, %v2696_v20  ;;  %v427_v9 = vadd.f32 %v2665_v10, %v2580_v31  ;;  %v2717_v51 = vadd.f32 %v1089_v52, %v962_v3  ;;  %v33_v23 = vld [vmem:[%s4793_s0 + $0x80] sm:$0xff]  ;;  %v34_v31 = vld [vmem:[%s4793_s0 + $0x88] sm:$0xff] }
  0x75   :  { %v965_v53 = vadd.f32 %v807_v44, %v2649_v5  ;;  %v803_v4 = vrot.slane %v568_v30, 1  ;;  %v2721_v38 = vsel %vm146_vm0, 0.0, %v170_v61  ;;  %v1096_v40 = vsel %vm986_vm2, %v1093_v14, %v1095_v41  ;;  %v2742_v52 = vld [vmem:[%s4793_s0 + $0x180] sm:$0xff]  ;;  %v66_v27 = vld [vmem:[%s4793_s0 + $0x188] sm:$0xff] }
  0x76   :  { %4879 = vst [vmem:[#allocation8_spill] sm:$0xff] %v2717_v51  ;;  %v725_v39 = vsel %vm697_vm1, %v723_v11, %v724_v36  ;;  %v1012_v63 = vrot.slane %v520_v6, 2  ;;  %v1092_v12 = vrot.slane %v568_v30, 2  ;;  %v2731_v3 = vadd.f32 %v1016_v29, %v933_v34 }
  0x77   :  { %v2734_v5 = vadd.f32 %v476_v25, %v2702_v47  ;;  %v573_v61 = vadd.f32 %v477_v55, %v2709_v21  ;;  %v475_v36 = vadd.f32 %v2669_v1, %v2596_v49  ;;  %v729_v44 = vrot.slane %v2712_v32, 1 }
  0x78   :  { %4880 = vst [vmem:[#allocation9_spill] sm:$0xff] %v2731_v3  ;;  %v731_v29 = vrot.slane %v525_v16, 1  ;;  %v2749_v41 = vsel %vm146_vm0, 0.0, %v218_v33  ;;  %v523_v11 = vadd.f32 %v427_v9, %v2721_v38  ;;  %v805_v34 = vsel %vm697_vm1, %v803_v4, %v804_v43 }
  0x79   :  { %v932_v49 = vadd.f32 %v725_v39, %v520_v6  ;;  %v173_v25 = vrot.slane %v33_v23, 7  ;;  %v174_v55 = vrot.slane %v34_v31, 7  ;;  %v1014_v37 = vsel %vm986_vm2, %v1012_v63, %v1013_v18 }
  0x7a   :  { %v1094_v58 = vsel %vm986_vm2, %v1092_v12, %v1093_v14  ;;  %v221_v3 = vrot.slane %v2742_v52, 7  ;;  %v222_v51 = vrot.slane %v66_v27, 7  ;;  %v809_v19 = vrot.slane %v2734_v5, 1 }
  0x7b   :  { %v811_v60 = vrot.slane %v573_v61, 1  ;;  %v1018_v33 = vrot.slane %v2712_v32, 2  ;;  %v571_v13 = vadd.f32 %v475_v36, %v2749_v41  ;;  %v732_v43 = vsel %vm697_vm1, %v729_v44, %v731_v29 }
  0x7c   :  { %v1020_v6 = vrot.slane %v525_v16, 2  ;;  %v728_v4 = vrot.slane %v523_v11, 1  ;;  %v431_v18 = vadd.f32 %v2693_v45, %v2617_v7  ;;  %v2765_v14 = vsel %vm146_vm0, %v173_v25, %v174_v55 }
  0x7d   :  { %v2759_v9 = vpop.permute.xlu0 %1309  ;;  %v432_v39 = vadd.f32 %v2696_v20, %v2620_v35  ;;  %v479_v63 = vadd.f32 %v2702_v47, %v2629_v24  ;;  %v480_v12 = vadd.f32 %v2709_v21, %v2632_v46  ;;  %v964_v23 = vadd.f32 %v805_v34, %v568_v30 }
  0x7e   :  { %v2774_v31 = vsel %vm146_vm0, %v221_v3, %v222_v51  ;;  %v2777_v16 = vsel %vm146_vm0, %v174_v55, 0.0  ;;  %v2780_v7 = vsel %vm146_vm0, %v222_v51, 0.0  ;;  %v935_v36 = vadd.f32 %v732_v43, %v2712_v32 }
  0x7f   :  { %4881 = vst [vmem:[#allocation10_spill] sm:$0xff] %v2774_v31  ;;  %4882 = vst [vmem:[#allocation11_spill] sm:$0xff] %v2777_v16  ;;  %v1098_v35 = vrot.slane %v2734_v5, 2  ;;  %v1100_v52 = vrot.slane %v573_v61, 2  ;;  %v808_v27 = vrot.slane %v571_v13, 1  ;;  %v2784_v24 = vadd.f32 %v1096_v40, %v965_v53 }
  0x80   :  { %4883 = vst [vmem:[#allocation12_spill] sm:$0xff] %v2780_v7  ;;  %v812_v46 = vsel %vm697_vm1, %v809_v19, %v811_v60  ;;  %v1021_v30 = vsel %vm986_vm2, %v1018_v33, %v1020_v6  ;;  %v2789_v29 = vadd.f32 %v431_v18, %v2765_v14  ;;  %v730_v34 = vsel %vm697_vm1, %v728_v4, %v729_v44 }
  0x81   :  { %v528_v51 = vadd.f32 %v432_v39, %v2777_v16  ;;  %v2794_v55 = vadd.f32 %v479_v63, %v2774_v31  ;;  %v576_v32 = vadd.f32 %v480_v12, %v2780_v7  ;;  %v2797_v61 = vpop.permute.xlu0 %1314  ;;  %v2799_v53 = vadd.f32 %v1014_v37, %v932_v49 }
  0x82   :  { %v2801_v60 = vadd.f32 %v1094_v58, %v964_v23  ;;  %v1017_v40 = vrot.slane %v523_v11, 2  ;;  %v1097_v43 = vrot.slane %v571_v13, 2  ;;  %v967_v6 = vadd.f32 %v812_v46, %v2734_v5 }
  0x83   :  { %v1101_v44 = vsel %vm986_vm2, %v1098_v35, %v1100_v52  ;;  %v2805_v4 = vadd.f32 %v1021_v30, %v935_v36  ;;  %v810_v18 = vsel %vm697_vm1, %v808_v27, %v809_v19  ;;  %v934_v39 = vadd.f32 %v730_v34, %v523_v11  ;;  %v2819_v36 = vpop.permute.xlu1 %1319 }
  0x84   :  { %v4804_v63 = vrot.slane %v2789_v29, 1  ;;  %v2810_v12 = vsel %vm146_vm0, 0.0, %v173_v25  ;;  %v430_v58 = vadd.f32 %v2721_v38, %v2665_v10  ;;  %v2816_v37 = vmul.f32 %v2797_v61, %v2460_v42 }
  0x85   :  { %v736_v5 = vrot.slane %v528_v51, 1  ;;  %v4803_v49 = vrot.slane %v2794_v55, 1  ;;  %v816_v23 = vrot.slane %v576_v32, 1  ;;  %v966_v19 = vadd.f32 %v810_v18, %v571_v13  ;;  %v2836_v13 = vld [vmem:[%s4793_s0 + $0x90] sm:$0xff] }
  0x86   :  { %4884 = vst [vmem:[#allocation13_spill] sm:$0xff] %v2816_v37  ;;  %v1019_v11 = vsel %vm986_vm2, %v1017_v40, %v1018_v33  ;;  %v1099_v52 = vsel %vm986_vm2, %v1097_v43, %v1098_v35  ;;  %v478_v25 = vadd.f32 %v2749_v41, %v2669_v1  ;;  %v2827_v10 = vmul.f32 %v2759_v9, %v2428_v62  ;;  %v36_v33 = vld [vmem:[%s4793_s0 + $0x98] sm:$0xff] }
  0x87   :  { %v4806_v42 = vrot.slane %v2789_v29, 2  ;;  %v1025_v27 = vrot.slane %v528_v51, 2  ;;  %v2831_v46 = vsel %vm146_vm0, 0.0, %v221_v3  ;;  %v2841_v1 = vadd.f32 %v1101_v44, %v967_v6  ;;  %v68_v44 = vld [vmem:[%s4793_s0 + $0x198] sm:$0xff] }
  0x88   :  { %4885 = vst [vmem:[#allocation14_spill] sm:$0xff] %v2827_v10  ;;  %v4807_v62 = vrot.slane %v2794_v55, 2  ;;  %v1105_v35 = vrot.slane %v576_v32, 2  ;;  %v526_v30 = vadd.f32 %v430_v58, %v2810_v12  ;;  %v1666_v3 = vmul.f32 %v2816_v37, %v2816_v37  ;;  %v2861_v32 = vld [vmem:[%s4793_s0 + $0x190] sm:$0xff] }
  0x89   :  { %v2847_v34 = vadd.f32 %v1019_v11, %v934_v39  ;;  %v737_v51 = vsel %vm697_vm1, %v4804_v63, %v736_v5  ;;  %v817_v40 = vsel %vm697_vm1, %v4803_v49, %v816_v23  ;;  %v2855_v43 = vadd.f32 %v1099_v52, %v966_v19  ;;  %v2878_v11 = vpop.permute.xlu1 %1324 }
  0x8a   :  { %v574_v6 = vadd.f32 %v478_v25, %v2831_v46  ;;  %v177_v39 = vrot.slane %v36_v33, 7  ;;  %v2869_v58 = vmul.f32 %v2819_v36, %v2360_v59  ;;  %v1665_v5 = vmul.f32 %v2827_v10, %v2827_v10 }
  0x8b   :  { %4886 = vst [vmem:[#allocation15_spill] sm:$0xff] %v2855_v43  ;;  %v1533_v23 = vsel %vm1531_vm3, %v2816_v37, 0.0  ;;  %v1026_v19 = vsel %vm986_vm2, %v4806_v42, %v1025_v27  ;;  %v937_v52 = vadd.f32 %v737_v51, %v2789_v29  ;;  %v969_v25 = vadd.f32 %v817_v40, %v2794_v55 }
  0x8c   :  { %4887 = vst [vmem:[#allocation16_spill] sm:$0xff] %v2869_v58  ;;  %v1106_v59 = vsel %vm986_vm2, %v4807_v62, %v1105_v35  ;;  %v733_v33 = vrot.slane %v526_v30, 1  ;;  %v1532_v49 = vsel %vm1531_vm3, %v2827_v10, 0.0  ;;  %v1730_v63 = vsel %vm1531_vm3, %v1666_v3, 0.0 }
  0x8d   :  { %v225_v37 = vrot.slane %v68_v44, 7  ;;  %v1534_v27 = vadd.f32 %v1533_v23, %v1532_v49  ;;  %v813_v42 = vrot.slane %v574_v6, 1  ;;  %v4888_v43 = vrot.slane %v2836_v13, 7  ;;  %v2905_v23 = vpop.permute.xlu0 %1329 }
  0x8e   :  { %v434_v40 = vadd.f32 %v2765_v14, %v2693_v45  ;;  %v1667_v35 = vmul.f32 %v2869_v58, %v2869_v58  ;;  %v1729_v62 = vsel %vm1531_vm3, %v1665_v5, 0.0  ;;  %v2901_v3 = vmul.f32 %v2878_v11, %v2439_v15 }
  0x8f   :  { %v2892_v51 = vsel %vm146_vm0, %v4888_v43, %v177_v39  ;;  %v435_v49 = vadd.f32 %v2777_v16, %v2696_v20  ;;  %v1731_v44 = vadd.f32 %v1730_v63, %v1729_v62  ;;  %v2908_v43 = vsel %vm146_vm0, %v177_v39, 0.0 }
  0x90   :  { %4889 = vst [vmem:[#allocation17_spill] sm:$0xff] %v2892_v51  ;;  %4890 = vst [vmem:[#allocation18_spill] sm:$0xff] %v2901_v3  ;;  %v482_v45 = vadd.f32 %v2774_v31, %v2702_v47  ;;  %v483_v18 = vadd.f32 %v2780_v7, %v2709_v21  ;;  %v1535_v5 = vsel %vm1531_vm3, %v2869_v58, 0.0  ;;  %v1022_v15 = vrot.slane %v526_v30, 2 }
  0x91   :  { %v4891_v10 = vrot.slane %v2861_v32, 7  ;;  %v2922_v63 = vsel %vm146_vm0, %v225_v37, 0.0  ;;  %v1536_v62 = vadd.f32 %v1535_v5, %v1534_v27  ;;  %v4892_v39 = vrot.slane %v2789_v29, 1  ;;  %v2938_v5 = vpop.permute.xlu1 %1334 }
  0x92   :  { %v1102_v31 = vrot.slane %v574_v6, 2  ;;  %v2928_v21 = vadd.f32 %v434_v40, %v2892_v51  ;;  %v1732_v58 = vsel %vm1531_vm3, %v1667_v35, 0.0  ;;  %v1668_v7 = vmul.f32 %v2901_v3, %v2901_v3 }
  0x93   :  { %v2919_v20 = vsel %vm146_vm0, %v4891_v10, %v225_v37  ;;  %v735_v47 = vsel %vm697_vm1, %v733_v33, %v4892_v39  ;;  %v2935_v10 = vmul.f32 %v2905_v23, %v2558_v54  ;;  %v531_v37 = vadd.f32 %v435_v49, %v2908_v43 }
  0x94   :  { %v1733_v27 = vadd.f32 %v1732_v58, %v1731_v44  ;;  %v2940_v16 = vadd.f32 %v1026_v19, %v937_v52  ;;  %v2943_v33 = vadd.f32 %v482_v45, %v2919_v20  ;;  %v579_v40 = vadd.f32 %v483_v18, %v2922_v63 }
  0x95   :  { %4893 = vst [vmem:[#allocation19_spill] sm:$0xff] %v2935_v10  ;;  %v1537_v35 = vsel %vm1531_vm3, %v2901_v3, 0.0  ;;  %v2948_v39 = vadd.f32 %v1106_v59, %v969_v25  ;;  %v4894_v54 = vrot.slane %v2794_v55, 1  ;;  %v936_v49 = vadd.f32 %v735_v47, %v526_v30 }
  0x96   :  { %v1538_v58 = vadd.f32 %v1537_v35, %v1536_v62  ;;  %v4895_v44 = vrot.slane %v2789_v29, 2  ;;  %v4896_v52 = vrot.slane %v2794_v55, 2  ;;  %v739_v18 = vrot.slane %v2928_v21, 1  ;;  %v2967_v29 = vpop.permute.xlu0 %1339 }
  0x97   :  { %v815_v51 = vsel %vm697_vm1, %v813_v42, %v4894_v54  ;;  %v1734_v3 = vsel %vm1531_vm3, %v1668_v7, 0.0  ;;  %v2963_v25 = vmul.f32 %v2938_v5, %v2491_v0  ;;  %v1669_v42 = vmul.f32 %v2935_v10, %v2935_v10 }
  0x98   :  { %v1024_v19 = vsel %vm986_vm2, %v1022_v15, %v4895_v44  ;;  %v1104_v45 = vsel %vm986_vm2, %v1102_v31, %v4896_v52  ;;  %v741_v30 = vrot.slane %v531_v37, 1  ;;  %v1735_v59 = vadd.f32 %v1734_v3, %v1733_v27 }
  0x99   :  { %4897 = vst [vmem:[#allocation20_spill] sm:$0xff] %v2963_v25  ;;  %v968_v15 = vadd.f32 %v815_v51, %v574_v6  ;;  %v4816_v55 = vrot.slane %v2943_v33, 1  ;;  %v821_v62 = vrot.slane %v579_v40, 1  ;;  %v1539_v31 = vsel %vm1531_vm3, %v2935_v10, 0.0 }
  0x9a   :  { %v2972_v47 = vadd.f32 %v1024_v19, %v936_v49  ;;  %v4898_v7 = vrot.slane %v2836_v13, 7  ;;  %v433_v35 = vadd.f32 %v2810_v12, %v2721_v38  ;;  %v1540_v3 = vadd.f32 %v1539_v31, %v1538_v58  ;;  %v2996_v38 = vld [vmem:[%s4793_s0 + $0xa0] sm:$0xff]  ;;  %v1345_v58 = vpop.permute.xlu1 %1344 }
  0x9b   :  { %v4817_v27 = vrot.slane %v2928_v21, 2  ;;  %v1030_v6 = vrot.slane %v531_v37, 2  ;;  %v4818_v51 = vrot.slane %v2943_v33, 2  ;;  %v1670_v54 = vmul.f32 %v2963_v25, %v2963_v25 }
  0x9c   :  { %v2977_v0 = vsel %vm146_vm0, 0.0, %v4898_v7  ;;  %v1736_v49 = vsel %vm1531_vm3, %v1669_v42, 0.0  ;;  %v2988_v13 = vmul.f32 %v2967_v29, %v2641_v56  ;;  %v742_v44 = vsel %vm697_vm1, %v739_v18, %v741_v30 }
  0x9d   :  { %v1737_v37 = vadd.f32 %v1736_v49, %v1735_v59  ;;  %v822_v19 = vsel %vm697_vm1, %v4816_v55, %v821_v62  ;;  %v1110_v52 = vrot.slane %v579_v40, 2  ;;  %v481_v56 = vadd.f32 %v2831_v46, %v2749_v41 }
  0x9e   :  { %4899 = vst [vmem:[#allocation21_spill] sm:$0xff] %v2988_v13  ;;  %v1541_v42 = vsel %vm1531_vm3, %v2963_v25, 0.0  ;;  %v3005_v31 = vadd.f32 %v1104_v45, %v968_v15  ;;  %v4900_v30 = vrot.slane %v2861_v32, 7  ;;  %v3013_v59 = vadd.f32 %v433_v35, %v2977_v0 }
  0x9f   :  { %v1542_v49 = vadd.f32 %v1541_v42, %v1540_v3  ;;  %v939_v62 = vadd.f32 %v742_v44, %v2928_v21  ;;  %v1031_v41 = vsel %vm986_vm2, %v4817_v27, %v1030_v6  ;;  %v1738_v45 = vsel %vm1531_vm3, %v1670_v54, 0.0  ;;  %v3030_v3 = vld [vmem:[%s4793_s0 + $0xa8] sm:$0xff]  ;;  %v3035_v6 = vld [vmem:[%s4793_s0 + $0x1a0] sm:$0xff]  ;;  %v1350_v44 = vpop.permute.xlu0 %1349 }
  0xa0   :  { %v3010_v7 = vsel %vm146_vm0, 0.0, %v4900_v30  ;;  %v3022_v15 = vmul.f32 %v1345_v58, %v2592_v22  ;;  %v1671_v32 = vmul.f32 %v2988_v13, %v2988_v13  ;;  %v971_v35 = vadd.f32 %v822_v19, %v2943_v33 }
  0xa1   :  { %v3039_v54 = vmul.f32 %v2819_v36, %v2369_v8  ;;  %v1739_v22 = vadd.f32 %v1738_v45, %v1737_v37  ;;  %v1111_v19 = vsel %vm986_vm2, %v4818_v51, %v1110_v52  ;;  %v3045_v42 = vadd.f32 %v481_v56, %v3010_v7  ;;  %v4910_v8 = vld [vmem:[#allocation5_spill] sm:$0xff] }
  0xa2   :  { %4901 = vst [vmem:[#allocation22_spill] sm:$0xff] %v3022_v15  ;;  %v3049_v30 = vmul.f32 %v2759_v9, %v2430_v48  ;;  %v1543_v55 = vsel %vm1531_vm3, %v2988_v13, 0.0  ;;  %v738_v27 = vrot.slane %v3013_v59, 1  ;;  %v3055_v37 = vadd.f32 %v1031_v41, %v939_v62  ;;  %v1355_v41 = vpop.permute.xlu1 %1354 }
  0xa3   :  { %4902 = vst [vmem:[#allocation23_spill] sm:$0xff] %v3039_v54  ;;  %v1544_v36 = vadd.f32 %v1543_v55, %v1542_v49  ;;  %v3061_v56 = vmul.f32 %v2878_v11, %v2456_v26  ;;  %v1672_v48 = vmul.f32 %v3022_v15, %v3022_v15  ;;  %v1740_v9 = vsel %vm1531_vm3, %v1671_v32, 0.0 }
  0xa4   :  { %4903 = vst [vmem:[#allocation24_spill] sm:$0xff] %v3049_v30  ;;  %v3067_v51 = vmul.f32 %v1350_v44, %v2683_v50  ;;  %v1699_v55 = vmul.f32 %v3039_v54, %v3039_v54  ;;  %v3073_v49 = vmul.f32 %v2797_v61, %v2463_v28  ;;  %v1741_v62 = vadd.f32 %v1740_v9, %v1739_v22 }
  0xa5   :  { %4904 = vst [vmem:[#allocation25_spill] sm:$0xff] %v3061_v56  ;;  %v3075_v52 = vadd.f32 %v1111_v19, %v971_v35  ;;  %v1697_v26 = vmul.f32 %v3049_v30, %v3049_v30  ;;  %v3081_v11 = vmul.f32 %v2938_v5, %v2556_v2  ;;  %v1545_v50 = vsel %vm1531_vm3, %v3022_v15, 0.0  ;;  %v1360_v2 = vpop.permute.xlu0 %1359  ;;  %v4921_v15 = vld [vmem:[#allocation9_spill] sm:$0xff] }
  0xa6   :  { %4905 = vst [vmem:[#allocation26_spill] sm:$0xff] %v3067_v51  ;;  %4906 = vst [vmem:[#allocation27_spill] sm:$0xff] %v3073_v49  ;;  %v3088_v32 = vsel %vm697_vm1, %v738_v27, %v739_v18  ;;  %v3092_v28 = vsel %vm1531_vm3, %v3039_v54, 0.0  ;;  %v3096_v61 = vsel %vm1531_vm3, %v3049_v30, 0.0  ;;  %v1546_v35 = vadd.f32 %v1545_v50, %v1544_v36  ;;  %v4919_v30 = vld [vmem:[#allocation8_spill] sm:$0xff] }
  0xa7   :  { %4907 = vst [vmem:[#allocation28_spill] sm:$0xff] %v3081_v11  ;;  %v1700_v5 = vmul.f32 %v3061_v56, %v3061_v56  ;;  %v1742_v22 = vsel %vm1531_vm3, %v1672_v48, 0.0  ;;  %v3103_v19 = vmul.f32 %v1355_v41, %v2645_v57  ;;  %v1673_v18 = vmul.f32 %v3067_v51, %v3067_v51 }
  0xa8   :  { %v3108_v27 = vsel %vm1531_vm3, %v1699_v55, 0.0  ;;  %v1698_v9 = vmul.f32 %v3073_v49, %v3073_v49  ;;  %v3114_v36 = vmul.f32 %v2905_v23, %v2569_v17  ;;  %v1743_v50 = vadd.f32 %v1742_v22, %v1741_v62  ;;  %v4912_v23 = vld [vmem:[#allocation6_spill] sm:$0xff]  ;;  %v1365_v22 = vpop.permute.xlu1 %1364 }
  0xa9   :  { %4908 = vst [vmem:[#allocation29_spill] sm:$0xff] %v3103_v19  ;;  %v3117_v48 = vsel %vm1531_vm3, %v1697_v26, 0.0  ;;  %v1702_v57 = vmul.f32 %v3081_v11, %v3081_v11  ;;  %v3122_v40 = vmul.f32 %v1345_v58, %v4910_v8  ;;  %v1547_v55 = vsel %vm1531_vm3, %v3067_v51, 0.0 }
  0xaa   :  { %4909 = vst [vmem:[#allocation30_spill] sm:$0xff] %v3114_v36  ;;  %v3128_v45 = vsel %vm1531_vm3, %v3061_v56, 0.0  ;;  %v3132_v17 = vsel %vm1531_vm3, %v3073_v49, 0.0  ;;  %v3136_v62 = vmul.f32 %v2967_v29, %v4912_v23  ;;  %v1548_v26 = vadd.f32 %v1547_v55, %v1546_v35  ;;  %v4917_v23 = vld [vmem:[#allocation7_spill] sm:$0xff] }
  0xab   :  { %4911 = vst [vmem:[#allocation5_spill] sm:$0xff] %v3122_v40  ;;  %v3139_v58 = vsel %vm1531_vm3, %v1700_v5, 0.0  ;;  %v1674_v8 = vmul.f32 %v3103_v19, %v3103_v19  ;;  %v1744_v54 = vsel %vm1531_vm3, %v1673_v18, 0.0  ;;  %v3145_v56 = vmul.f32 %v1360_v2, %v2799_v53 }
  0xac   :  { %4913 = vst [vmem:[#allocation6_spill] sm:$0xff] %v3136_v62  ;;  %v3148_v49 = vsel %vm1531_vm3, %v1698_v9, 0.0  ;;  %v3152_v29 = vsel %vm1531_vm3, %v3081_v11, 0.0  ;;  %v1701_v35 = vmul.f32 %v3114_v36, %v3114_v36  ;;  %v1745_v5 = vadd.f32 %v1744_v54, %v1743_v50 }
  0xad   :  { %4914 = vst [vmem:[#allocation31_spill] sm:$0xff] %v3145_v56  ;;  %4915 = vst [vmem:[#allocation32_spill] sm:$0xff] %v3152_v29  ;;  %v3157_v55 = vsel %vm1531_vm3, %v1702_v57, 0.0  ;;  %v1704_v18 = vmul.f32 %v3122_v40, %v3122_v40  ;;  %v3162_v53 = vmul.f32 %v1355_v41, %v4917_v23  ;;  %v1549_v9 = vsel %vm1531_vm3, %v3103_v19, 0.0 }
  0xae   :  { %4916 = vst [vmem:[#allocation33_spill] sm:$0xff] %v3157_v55  ;;  %v1703_v11 = vmul.f32 %v3136_v62, %v3136_v62  ;;  %v3169_v51 = vmul.f32 %v1350_v44, %v4919_v30  ;;  %v3172_v54 = vmul.f32 %v1365_v22, %v4921_v15  ;;  %v1550_v50 = vadd.f32 %v1549_v9, %v1548_v26  ;;  %v1375_v26 = vpop.permute.xlu1 %1374  ;;  %v1370_v9 = vpop.permute.xlu0 %1369 }
  0xaf   :  { %4918 = vst [vmem:[#allocation7_spill] sm:$0xff] %v3162_v53  ;;  %v3176_v57 = vsel %vm1531_vm3, %v3114_v36, 0.0  ;;  %v1746_v41 = vsel %vm1531_vm3, %v1674_v8, 0.0  ;;  %v3180_v23 = vmul.f32 %v1365_v22, %v2784_v24  ;;  %v1675_v19 = vmul.f32 %v3145_v56, %v3145_v56 }
  0xb0   :  { %4920 = vst [vmem:[#allocation8_spill] sm:$0xff] %v3169_v51  ;;  %4922 = vst [vmem:[#allocation9_spill] sm:$0xff] %v3172_v54  ;;  %v3185_v13 = vsel %vm1531_vm3, %v1701_v35, 0.0  ;;  %v3189_v15 = vsel %vm1531_vm3, %v3122_v40, 0.0  ;;  %v3192_v44 = vmul.f32 %v1360_v2, %v2801_v60  ;;  %v1747_v30 = vadd.f32 %v1746_v41, %v1745_v5 }
  0xb1   :  { %4923 = vst [vmem:[#allocation34_spill] sm:$0xff] %v3180_v23  ;;  %4924 = vst [vmem:[#allocation35_spill] sm:$0xff] %v3185_v13  ;;  %v3195_v8 = vsel %vm1531_vm3, %v1704_v18, 0.0  ;;  %v3199_v24 = vsel %vm1531_vm3, %v3136_v62, 0.0  ;;  %v1706_v22 = vmul.f32 %v3162_v53, %v3162_v53  ;;  %v1551_v35 = vsel %vm1531_vm3, %v3145_v56, 0.0 }
  0xb2   :  { %4925 = vst [vmem:[#allocation36_spill] sm:$0xff] %v3189_v15  ;;  %4926 = vst [vmem:[#allocation37_spill] sm:$0xff] %v3192_v44  ;;  %v3206_v40 = vsel %vm1531_vm3, %v1703_v11, 0.0  ;;  %v1705_v60 = vmul.f32 %v3169_v51, %v3169_v51  ;;  %v1676_v2 = vmul.f32 %v3172_v54, %v3172_v54  ;;  %v1552_v5 = vadd.f32 %v1551_v35, %v1550_v50 }
  0xb3   :  { %4927 = vst [vmem:[#allocation38_spill] sm:$0xff] %v3195_v8  ;;  %4928 = vst [vmem:[#allocation39_spill] sm:$0xff] %v3199_v24  ;;  %v1708_v18 = vmul.f32 %v3180_v23, %v3180_v23  ;;  %v1748_v41 = vsel %vm1531_vm3, %v1675_v19, 0.0  ;;  %v3216_v62 = vmul.f32 %v1375_v26, %v2805_v4  ;;  %v3219_v36 = vmul.f32 %v1370_v9, %v2847_v34  ;;  %v4936_v19 = vld [vmem:[#allocation15_spill] sm:$0xff] }
  0xb4   :  { %4929 = vst [vmem:[#allocation40_spill] sm:$0xff] %v3206_v40  ;;  %v3223_v11 = vsel %vm1531_vm3, %v3162_v53, 0.0  ;;  %v1707_v56 = vmul.f32 %v3192_v44, %v3192_v44  ;;  %v1749_v25 = vadd.f32 %v1748_v41, %v1747_v30  ;;  %v3228_v50 = vmul.f32 %v1375_v26, %v2841_v1 }
  0xb5   :  { %4930 = vst [vmem:[#allocation41_spill] sm:$0xff] %v3216_v62  ;;  %4931 = vst [vmem:[#allocation42_spill] sm:$0xff] %v3219_v36  ;;  %v3231_v35 = vsel %vm1531_vm3, %v1706_v22, 0.0  ;;  %v3235_v4 = vsel %vm1531_vm3, %v3169_v51, 0.0  ;;  %v1553_v34 = vsel %vm1531_vm3, %v3172_v54, 0.0  ;;  %v3240_v53 = vmul.f32 %v1370_v9, %v4936_v19  ;;  %v1385_v22 = vpop.permute.xlu1 %1384  ;;  %v1380_v19 = vpop.permute.xlu0 %1379 }
  0xb6   :  { %4932 = vst [vmem:[#allocation43_spill] sm:$0xff] %v3223_v11  ;;  %4933 = vst [vmem:[#allocation44_spill] sm:$0xff] %v3228_v50  ;;  %v3243_v10 = vsel %vm1531_vm3, %v1705_v60, 0.0  ;;  %v3247_v1 = vsel %vm1531_vm3, %v3180_v23, 0.0  ;;  %v3251_v30 = vsel %vm1531_vm3, %v3192_v44, 0.0  ;;  %v1554_v26 = vadd.f32 %v1553_v34, %v1552_v5 }
  0xb7   :  { %4934 = vst [vmem:[#allocation45_spill] sm:$0xff] %v3231_v35  ;;  %4935 = vst [vmem:[#allocation46_spill] sm:$0xff] %v3235_v4  ;;  %v1750_v41 = vsel %vm1531_vm3, %v1676_v2, 0.0  ;;  %v3255_v51 = vsel %vm1531_vm3, %v1708_v18, 0.0  ;;  %v1678_v9 = vmul.f32 %v3216_v62, %v3216_v62  ;;  %v1677_v60 = vmul.f32 %v3219_v36, %v3219_v36 }
  0xb8   :  { %4937 = vst [vmem:[#allocation15_spill] sm:$0xff] %v3240_v53  ;;  %4938 = vst [vmem:[#allocation47_spill] sm:$0xff] %v3243_v10  ;;  %v3262_v23 = vsel %vm1531_vm3, %v1707_v56, 0.0  ;;  %v1557_v44 = vsel %vm1531_vm3, %v3216_v62, 0.0  ;;  %v1710_v5 = vmul.f32 %v3228_v50, %v3228_v50  ;;  %v1751_v2 = vadd.f32 %v1750_v41, %v1749_v25 }
  0xb9   :  { %4939 = vst [vmem:[#allocation48_spill] sm:$0xff] %v3247_v1  ;;  %4940 = vst [vmem:[#allocation49_spill] sm:$0xff] %v3251_v30  ;;  %v1555_v18 = vsel %vm1531_vm3, %v3219_v36, 0.0  ;;  %v1709_v34 = vmul.f32 %v3240_v53, %v3240_v53  ;;  %v3273_v54 = vmul.f32 %v1385_v22, %v2940_v16  ;;  %v3280_v56 = vsel %vm1531_vm3, %v3228_v50, 0.0 }
  0xba   :  { %4941 = vst [vmem:[#allocation50_spill] sm:$0xff] %v3255_v51  ;;  %4942 = vst [vmem:[#allocation51_spill] sm:$0xff] %v3262_v23  ;;  %v3276_v51 = vmul.f32 %v1385_v22, %v2948_v39  ;;  %v1556_v62 = vadd.f32 %v1555_v18, %v1554_v26  ;;  %v3284_v25 = vsel %vm1531_vm3, %v3240_v53, 0.0  ;;  %v3287_v41 = vmul.f32 %v1380_v19, %v2972_v47  ;;  %v4948_v23 = vld [vmem:[#allocation17_spill] sm:$0xff] }
  0xbb   :  { %4943 = vst [vmem:[#allocation52_spill] sm:$0xff] %v3273_v54  ;;  %4945 = vst [vmem:[#allocation54_spill] sm:$0xff] %v3280_v56  ;;  %v1754_v36 = vsel %vm1531_vm3, %v1678_v9, 0.0  ;;  %v1752_v16 = vsel %vm1531_vm3, %v1677_v60, 0.0  ;;  %v437_v39 = vadd.f32 %v4948_v23, %v2765_v14  ;;  %v436_v22 = vadd.f32 %v2977_v0, %v2810_v12 }
  0xbc   :  { %4944 = vst [vmem:[#allocation53_spill] sm:$0xff] %v3276_v51  ;;  %4946 = vst [vmem:[#allocation55_spill] sm:$0xff] %v3284_v25  ;;  %v1753_v50 = vadd.f32 %v1752_v16, %v1751_v2  ;;  %v3296_v26 = vmul.f32 %v1380_v19, %v3005_v31  ;;  %v4950_v18 = vrot.slane %v3030_v3, 7  ;;  %v4951_v53 = vrot.slane %v2996_v38, 7  ;;  %v1395_v38 = vpop.permute.xlu1 %1394 }
  0xbd   :  { %4947 = vst [vmem:[#allocation56_spill] sm:$0xff] %v3287_v41  ;;  %v3311_v14 = vsel %vm1531_vm3, %v1710_v5, 0.0  ;;  %v3314_v12 = vsel %vm1531_vm3, %v1709_v34, 0.0  ;;  %v1680_v31 = vmul.f32 %v3273_v54, %v3273_v54  ;;  %v1712_v19 = vmul.f32 %v3276_v51, %v3276_v51 }
  0xbe   :  { %4949 = vst [vmem:[#allocation17_spill] sm:$0xff] %v3296_v26  ;;  %v3303_v47 = vsel %vm146_vm0, %v4951_v53, %v4950_v18  ;;  %v4952_v9 = vmov %v4951_v53  ;;  %4953 = vst [vmem:[#allocation57_spill] sm:$0xff] %v3311_v14  ;;  %v1558_v2 = vadd.f32 %v1557_v44, %v1556_v62  ;;  %v1679_v53 = vmul.f32 %v3287_v41, %v3287_v41  ;;  %v4955_v18 = vld [vmem:[#allocation11_spill] sm:$0xff] }
  0xbf   :  { %v3308_v60 = vsel %vm146_vm0, 0.0, %v4952_v9  ;;  %4954 = vst [vmem:[#allocation58_spill] sm:$0xff] %v3314_v12  ;;  %v938_v16 = vadd.f32 %v3088_v32, %v3013_v59  ;;  %v438_v5 = vadd.f32 %v2908_v43, %v4955_v18  ;;  %v4956_v34 = vrot.slane %v2928_v21, 2 }
  0xc0   :  { %v4957_v9 = vrot.slane %v3013_v59, 2  ;;  %v4958_v12 = vrot.slane %v3030_v3, 7  ;;  %v3337_v44 = vadd.f32 %v437_v39, %v3303_v47  ;;  %v532_v56 = vadd.f32 %v436_v22, %v3308_v60 }
  0xc1   :  { %v1561_v32 = vsel %vm1531_vm3, %v3273_v54, 0.0  ;;  %v3344_v21 = vsel %vm1531_vm3, %v3276_v51, 0.0  ;;  %v1711_v59 = vmul.f32 %v3296_v26, %v3296_v26  ;;  %v1755_v18 = vadd.f32 %v1754_v36, %v1753_v50  ;;  %v40_v36 = vld [vmem:[%s4793_s0 + $0xb8] sm:$0xff] }
  0xc2   :  { %v1029_v14 = vsel %vm986_vm2, %v4957_v9, %v4956_v34  ;;  %v3334_v62 = vsel %vm146_vm0, %v4958_v12, 0.0  ;;  %4959 = vst [vmem:[#allocation11_spill] sm:$0xff] %v3344_v21  ;;  %v1559_v3 = vsel %vm1531_vm3, %v3287_v41, 0.0  ;;  %v3352_v39 = vsel %vm1531_vm3, %v3296_v26, 0.0  ;;  %v39_v34 = vld [vmem:[%s4793_s0 + $0xb0] sm:$0xff] }
  0xc3   :  { %4960 = vst [vmem:[#allocation59_spill] sm:$0xff] %v3352_v39  ;;  %v3355_v22 = vmul.f32 %v1395_v38, %v3055_v37  ;;  %v3358_v12 = vmul.f32 %v1395_v38, %v3075_v52  ;;  %v1758_v50 = vsel %vm1531_vm3, %v1680_v31, 0.0  ;;  %v3368_v9 = vsel %vm1531_vm3, %v1712_v19, 0.0  ;;  %v3372_v38 = vpop.permute.xlu0 %1389 }
  0xc4   :  { %4962 = vst [vmem:[#allocation61_spill] sm:$0xff] %v3368_v9  ;;  %v1227_v51 = vadd.f32 %v1029_v14, %v938_v16  ;;  %v534_v37 = vadd.f32 %v438_v5, %v3334_v62  ;;  %v1560_v26 = vadd.f32 %v1559_v3, %v1558_v2  ;;  %v1756_v52 = vsel %vm1531_vm3, %v1679_v53, 0.0  ;;  %v70_v3 = vld [vmem:[%s4793_s0 + $0x1a8] sm:$0xff] }
  0xc5   :  { %4961 = vst [vmem:[#allocation60_spill] sm:$0xff] %v3355_v22  ;;  %v744_v54 = vrot.slane %v3337_v44, 1  ;;  %v743_v41 = vrot.slane %v532_v56, 1  ;;  %v1757_v21 = vadd.f32 %v1756_v52, %v1755_v18  ;;  %v3376_v39 = vsel %vm1531_vm3, %v1711_v59, 0.0 }
  0xc6   :  { %4963 = vst [vmem:[#allocation62_spill] sm:$0xff] %v3376_v39  ;;  %v182_v25 = vrot.slane %v39_v34, 7  ;;  %v183_v31 = vrot.slane %v40_v36, 7  ;;  %v3380_v19 = vsel %vm1531_vm3, %v3355_v22, 0.0  ;;  %v3384_v14 = vsel %vm1531_vm3, %v3358_v12, 0.0 }
  0xc7   :  { %4964 = vst [vmem:[#allocation63_spill] sm:$0xff] %v3384_v14  ;;  %v4965_v2 = vrot.slane %v2943_v33, 1  ;;  %v4966_v53 = vrot.slane %v3045_v42, 1  ;;  %v1107_v5 = vrot.slane %v3045_v42, 2  ;;  %v1682_v59 = vmul.f32 %v3355_v22, %v3355_v22 }
  0xc8   :  { %v3395_v18 = vmul.f32 %v3372_v38, %v1227_v51  ;;  %v746_v34 = vrot.slane %v534_v37, 1  ;;  %v1033_v36 = vrot.slane %v3337_v44, 2  ;;  %v745_v52 = vsel %vm697_vm1, %v743_v41, %v744_v54 }
  0xc9   :  { %v820_v16 = vsel %vm697_vm1, %v4966_v53, %v4965_v2  ;;  %v1032_v14 = vrot.slane %v532_v56, 2  ;;  %v440_v2 = vadd.f32 %v3303_v47, %v4948_v23  ;;  %v439_v53 = vadd.f32 %v3308_v60, %v2977_v0  ;;  %v41_v0 = vld [vmem:[%s4793_s0 + $0xc0] sm:$0xff] }
  0xca   :  { %4967 = vst [vmem:[#allocation64_spill] sm:$0xff] %v3395_v18  ;;  %v970_v22 = vadd.f32 %v820_v16, %v3045_v42  ;;  %v3408_v51 = vsel %vm146_vm0, %v182_v25, %v183_v31  ;;  %v441_v9 = vadd.f32 %v3334_v62, %v2908_v43  ;;  %v3413_v39 = vsel %vm146_vm0, 0.0, %v182_v25  ;;  %v42_v43 = vld [vmem:[%s4793_s0 + $0xc8] sm:$0xff] }
  0xcb   :  { %v4968_v41 = vrot.slane %v2943_v33, 2  ;;  %v1562_v35 = vadd.f32 %v1561_v32, %v1560_v26  ;;  %v228_v23 = vrot.slane %v70_v3, 7  ;;  %v3419_v30 = vsel %vm146_vm0, %v183_v31, 0.0 }
  0xcc   :  { %v1681_v42 = vmul.f32 %v3395_v18, %v3395_v18  ;;  %v747_v33 = vsel %vm697_vm1, %v744_v54, %v746_v34  ;;  %v1035_v25 = vrot.slane %v534_v37, 2  ;;  %v940_v16 = vadd.f32 %v745_v52, %v532_v56  ;;  %v4970_v56 = vld [vmem:[#allocation10_spill] sm:$0xff]  ;;  %v3447_v34 = vpop.permute.xlu0 %1399 }
  0xcd   :  { %v1109_v1 = vsel %vm986_vm2, %v1107_v5, %v4968_v41  ;;  %v1762_v26 = vsel %vm1531_vm3, %v1682_v59, 0.0  ;;  %v1034_v32 = vsel %vm986_vm2, %v1032_v14, %v1033_v36  ;;  %v536_v31 = vadd.f32 %v440_v2, %v3408_v51 }
  0xce   :  { %v535_v5 = vadd.f32 %v439_v53, %v3413_v39  ;;  %v1759_v3 = vadd.f32 %v1758_v50, %v1757_v21  ;;  %v537_v41 = vadd.f32 %v441_v9, %v3419_v30  ;;  %v185_v10 = vrot.slane %v41_v0, 7 }
  0xcf   :  { %v186_v11 = vrot.slane %v42_v43, 7  ;;  %v1259_v8 = vadd.f32 %v1109_v1, %v970_v22  ;;  %v4969_v4 = vrot.slane %v3035_v6, 7  ;;  %v485_v37 = vadd.f32 %v2919_v20, %v4970_v56  ;;  %v44_v56 = vld [vmem:[%s4793_s0 + $0xd8] sm:$0xff] }
  0xd0   :  { %v941_v14 = vadd.f32 %v747_v33, %v3337_v44  ;;  %v1563_v59 = vsel %vm1531_vm3, %v3395_v18, 0.0  ;;  %v1760_v21 = vsel %vm1531_vm3, %v1681_v42, 0.0  ;;  %v1036_v50 = vsel %vm986_vm2, %v1033_v36, %v1035_v25  ;;  %v4971_v25 = vld [vmem:[#allocation12_spill] sm:$0xff] }
  0xd1   :  { %v3438_v54 = vsel %vm146_vm0, %v4969_v4, %v228_v23  ;;  %v1229_v9 = vadd.f32 %v1034_v32, %v940_v16  ;;  %v749_v1 = vrot.slane %v536_v31, 1  ;;  %v748_v22 = vrot.slane %v535_v5, 1 }
  0xd2   :  { %v443_v4 = vadd.f32 %v3408_v51, %v3303_v47  ;;  %v444_v52 = vadd.f32 %v3419_v30, %v3334_v62  ;;  %v751_v2 = vrot.slane %v537_v41, 1  ;;  %v3454_v44 = vsel %vm146_vm0, %v185_v10, %v186_v11  ;;  %v3464_v47 = vpop.permute.xlu1 %1404 }
  0xd3   :  { %v3457_v53 = vsel %vm146_vm0, %v186_v11, 0.0  ;;  %v442_v36 = vadd.f32 %v3413_v39, %v3308_v60  ;;  %v1564_v0 = vadd.f32 %v1563_v59, %v1562_v35  ;;  %v1761_v43 = vadd.f32 %v1760_v21, %v1759_v3 }
  0xd4   :  { %v1230_v42 = vadd.f32 %v1036_v50, %v941_v14  ;;  %v3462_v33 = vsel %vm146_vm0, 0.0, %v185_v10  ;;  %v3467_v62 = vsel %vm146_vm0, %v228_v23, 0.0  ;;  %v486_v16 = vadd.f32 %v2922_v63, %v4971_v25  ;;  %v43_v23 = vld [vmem:[%s4793_s0 + $0xd0] sm:$0xff] }
  0xd5   :  { %v3472_v11 = vmul.f32 %v3447_v34, %v1229_v9  ;;  %v1038_v32 = vrot.slane %v536_v31, 2  ;;  %v750_v60 = vsel %vm697_vm1, %v748_v22, %v749_v1  ;;  %v1037_v35 = vrot.slane %v535_v5, 2 }
  0xd6   :  { %v3476_v3 = vadd.f32 %v443_v4, %v3454_v44  ;;  %v540_v10 = vadd.f32 %v444_v52, %v3457_v53  ;;  %v3486_v14 = vadd.f32 %v485_v37, %v3438_v54  ;;  %v752_v59 = vsel %vm697_vm1, %v749_v1, %v751_v2 }
  0xd7   :  { %4972 = vst [vmem:[#allocation10_spill] sm:$0xff] %v3472_v11  ;;  %v1040_v21 = vrot.slane %v537_v41, 2  ;;  %v538_v50 = vadd.f32 %v442_v36, %v3462_v33  ;;  %v3491_v9 = vmul.f32 %v3372_v38, %v1259_v8  ;;  %v3494_v22 = vmul.f32 %v3464_v47, %v1230_v42 }
  0xd8   :  { %v1566_v4 = vadd.f32 %v3380_v19, %v1564_v0  ;;  %v1763_v52 = vadd.f32 %v1762_v26, %v1761_v43  ;;  %v1683_v25 = vmul.f32 %v3472_v11, %v3472_v11  ;;  %v942_v18 = vadd.f32 %v750_v60, %v535_v5 }
  0xd9   :  { %4973 = vst [vmem:[#allocation12_spill] sm:$0xff] %v3494_v22  ;;  %v188_v37 = vrot.slane %v43_v23, 7  ;;  %v189_v40 = vrot.slane %v44_v56, 7  ;;  %v943_v15 = vadd.f32 %v752_v59, %v536_v31  ;;  %v1039_v41 = vsel %vm986_vm2, %v1037_v35, %v1038_v32  ;;  %v3521_v56 = vpop.permute.xlu0 %1409 }
  0xda   :  { %v754_v1 = vrot.slane %v3476_v3, 1  ;;  %v756_v2 = vrot.slane %v540_v10, 1  ;;  %v3502_v8 = vadd.f32 %v486_v16, %v3467_v62  ;;  %v1041_v19 = vsel %vm986_vm2, %v1038_v32, %v1040_v21  ;;  %4974 = vst [vmem:[#allocation65_spill] sm:$0xff] %v3521_v56 }
  0xdb   :  { %v753_v26 = vrot.slane %v538_v50, 1  ;;  %v1684_v36 = vmul.f32 %v3494_v22, %v3494_v22  ;;  %v1567_v5 = vsel %vm1531_vm3, %v3472_v11, 0.0  ;;  %v446_v31 = vadd.f32 %v3454_v44, %v3408_v51 }
  0xdc   :  { %v445_v0 = vadd.f32 %v3462_v33, %v3413_v39  ;;  %v1764_v43 = vsel %vm1531_vm3, %v1683_v25, 0.0  ;;  %v1231_v42 = vadd.f32 %v1039_v41, %v942_v18  ;;  %v3516_v16 = vsel %vm146_vm0, %v188_v37, %v189_v40  ;;  %v45_v25 = vld [vmem:[%s4793_s0 + $0xe0] sm:$0xff] }
  0xdd   :  { %v3519_v32 = vsel %vm146_vm0, 0.0, %v188_v37  ;;  %v1568_v60 = vadd.f32 %v1567_v5, %v1566_v4  ;;  %v1765_v35 = vadd.f32 %v1764_v43, %v1763_v52  ;;  %v1232_v23 = vadd.f32 %v1041_v19, %v943_v15  ;;  %v46_v15 = vld [vmem:[%s4793_s0 + $0xe8] sm:$0xff]  ;;  %v3534_v4 = vpop.permute.xlu1 %1414 }
  0xde   :  { %v757_v59 = vsel %vm697_vm1, %v754_v1, %v756_v2  ;;  %v1043_v51 = vrot.slane %v3476_v3, 2  ;;  %v755_v39 = vsel %vm697_vm1, %v753_v26, %v754_v1  ;;  %v1042_v21 = vrot.slane %v538_v50, 2 }
  0xdf   :  { %v447_v18 = vadd.f32 %v3457_v53, %v3419_v30  ;;  %v1045_v52 = vrot.slane %v540_v10, 2  ;;  %v3537_v37 = vsel %vm146_vm0, %v189_v40, 0.0  ;;  %v3540_v41 = vadd.f32 %v446_v31, %v3516_v16 }
  0xe0   :  { %v541_v1 = vadd.f32 %v445_v0, %v3519_v32  ;;  %v826_v30 = vrot.slane %v3502_v8, 1  ;;  %v1569_v2 = vsel %vm1531_vm3, %v3494_v22, 0.0  ;;  %v1766_v19 = vsel %vm1531_vm3, %v1684_v36, 0.0 }
  0xe1   :  { %v3548_v26 = vmul.f32 %v3521_v56, %v1231_v42  ;;  %v1570_v5 = vadd.f32 %v1569_v2, %v1568_v60  ;;  %v944_v10 = vadd.f32 %v755_v39, %v538_v50  ;;  %v191_v43 = vrot.slane %v45_v25, 7 }
  0xe2   :  { %v192_v40 = vrot.slane %v46_v15, 7  ;;  %v3551_v38 = vmul.f32 %v3534_v4, %v1232_v23  ;;  %v945_v31 = vadd.f32 %v757_v59, %v3476_v3  ;;  %v1044_v0 = vsel %vm986_vm2, %v1042_v21, %v1043_v51  ;;  %v3576_v15 = vpop.permute.xlu0 %1419 }
  0xe3   :  { %4975 = vst [vmem:[#allocation66_spill] sm:$0xff] %v3548_v26  ;;  %v543_v11 = vadd.f32 %v447_v18, %v3537_v37  ;;  %v1767_v55 = vadd.f32 %v1766_v19, %v1765_v35  ;;  %v1046_v22 = vsel %vm986_vm2, %v1043_v51, %v1045_v52  ;;  %v759_v36 = vrot.slane %v3540_v41, 1  ;;  %v3578_v52 = vpop.permute.xlu1 %1424 }
  0xe4   :  { %4976 = vst [vmem:[#allocation67_spill] sm:$0xff] %v3551_v38  ;;  %v758_v42 = vrot.slane %v541_v1, 1  ;;  %v1571_v50 = vsel %vm1531_vm3, %v3548_v26, 0.0  ;;  %v1685_v60 = vmul.f32 %v3548_v26, %v3548_v26  ;;  %v449_v23 = vadd.f32 %v3516_v16, %v3454_v44 }
  0xe5   :  { %v448_v3 = vadd.f32 %v3519_v32, %v3462_v33  ;;  %v1572_v59 = vadd.f32 %v1571_v50, %v1570_v5  ;;  %v1233_v39 = vadd.f32 %v1044_v0, %v944_v10  ;;  %v3567_v35 = vsel %vm146_vm0, %v191_v43, %v192_v40  ;;  %v47_v10 = vld [vmem:[%s4793_s0 + $0xf0] sm:$0xff] }
  0xe6   :  { %v3570_v51 = vsel %vm146_vm0, 0.0, %v191_v43  ;;  %v1573_v21 = vsel %vm1531_vm3, %v3551_v38, 0.0  ;;  %v1686_v18 = vmul.f32 %v3551_v38, %v3551_v38  ;;  %v1234_v25 = vadd.f32 %v1046_v22, %v945_v31  ;;  %v48_v22 = vld [vmem:[%s4793_s0 + $0xf8] sm:$0xff] }
  0xe7   :  { %v761_v44 = vrot.slane %v543_v11, 1  ;;  %v1048_v33 = vrot.slane %v3540_v41, 2  ;;  %v760_v2 = vsel %vm697_vm1, %v758_v42, %v759_v36  ;;  %v1047_v19 = vrot.slane %v541_v1, 2 }
  0xe8   :  { %v450_v5 = vadd.f32 %v3537_v37, %v3457_v53  ;;  %v1768_v43 = vsel %vm1531_vm3, %v1685_v60, 0.0  ;;  %v3592_v31 = vsel %vm146_vm0, %v192_v40, 0.0  ;;  %v3595_v0 = vadd.f32 %v449_v23, %v3567_v35 }
  0xe9   :  { %v544_v42 = vadd.f32 %v448_v3, %v3570_v51  ;;  %v1769_v50 = vadd.f32 %v1768_v43, %v1767_v55  ;;  %v3600_v38 = vmul.f32 %v3576_v15, %v1233_v39  ;;  %v1574_v26 = vadd.f32 %v1573_v21, %v1572_v59 }
  0xea   :  { %v3603_v24 = vmul.f32 %v3578_v52, %v1234_v25  ;;  %v946_v13 = vadd.f32 %v760_v2, %v541_v1  ;;  %v194_v60 = vrot.slane %v47_v10, 7  ;;  %v195_v29 = vrot.slane %v48_v22, 7  ;;  %v3625_v22 = vpop.permute.xlu0 %1429 }
  0xeb   :  { %4977 = vst [vmem:[#allocation68_spill] sm:$0xff] %v3600_v38  ;;  %v762_v40 = vsel %vm697_vm1, %v759_v36, %v761_v44  ;;  %v1050_v56 = vrot.slane %v543_v11, 2  ;;  %v1049_v23 = vsel %vm986_vm2, %v1047_v19, %v1048_v33  ;;  %v546_v3 = vadd.f32 %v450_v5, %v3592_v31  ;;  %4980 = vst [vmem:[#allocation70_spill] sm:$0xff] %v3625_v22 }
  0xec   :  { %4978 = vst [vmem:[#allocation69_spill] sm:$0xff] %v3603_v24  ;;  %v4979_v53 = vrot.slane %v3486_v14, 1  ;;  %v1770_v39 = vsel %vm1531_vm3, %v1686_v18, 0.0  ;;  %v764_v59 = vrot.slane %v3595_v0, 1  ;;  %v763_v21 = vrot.slane %v544_v42, 1 }
  0xed   :  { %v1687_v25 = vmul.f32 %v3600_v38, %v3600_v38  ;;  %v1771_v36 = vadd.f32 %v1770_v39, %v1769_v50  ;;  %v452_v11 = vadd.f32 %v3567_v35, %v3516_v16  ;;  %v1575_v44 = vsel %vm1531_vm3, %v3600_v38, 0.0 }
  0xee   :  { %v827_v55 = vsel %vm697_vm1, %v4979_v53, %v826_v30  ;;  %v947_v2 = vadd.f32 %v762_v40, %v3540_v41  ;;  %v1235_v30 = vadd.f32 %v1049_v23, %v946_v13  ;;  %v196_v18 = vsel %vm146_vm0, %v194_v60, %v195_v29 }
  0xef   :  { %v1688_v19 = vmul.f32 %v3603_v24, %v3603_v24  ;;  %v1576_v5 = vadd.f32 %v1575_v44, %v1574_v26  ;;  %v1051_v10 = vsel %vm986_vm2, %v1048_v33, %v1050_v56  ;;  %v766_v43 = vrot.slane %v546_v3, 1 }
  0xf0   :  { %v1053_v53 = vrot.slane %v3595_v0, 2  ;;  %v765_v16 = vsel %vm697_vm1, %v763_v21, %v764_v59  ;;  %v1052_v50 = vrot.slane %v544_v42, 2  ;;  %v453_v41 = vadd.f32 %v3592_v31, %v3537_v37 }
  0xf1   :  { %v1772_v13 = vsel %vm1531_vm3, %v1687_v25, 0.0  ;;  %v392_v40 = vsel %vm146_vm0, %v195_v29, 0.0  ;;  %v3633_v23 = vadd.f32 %v452_v11, %v196_v18  ;;  %v451_v56 = vadd.f32 %v3570_v51, %v3519_v32  ;;  %v3652_v32 = vpop.permute.xlu1 %1434 }
  0xf2   :  { %v1773_v26 = vadd.f32 %v1772_v13, %v1771_v36  ;;  %v1236_v33 = vadd.f32 %v1051_v10, %v947_v2  ;;  %v3638_v39 = vmul.f32 %v3625_v22, %v1235_v30  ;;  %v3641_v21 = vsel %vm146_vm0, 0.0, %v194_v60 }
  0xf3   :  { %v4982_v44 = vrot.slane %v3035_v6, 7  ;;  %v484_v29 = vadd.f32 %v3010_v7, %v2831_v46  ;;  %v1577_v25 = vsel %vm1531_vm3, %v3603_v24, 0.0  ;;  %v948_v36 = vadd.f32 %v765_v16, %v544_v42 }
  0xf4   :  { %4981 = vst [vmem:[#allocation71_spill] sm:$0xff] %v3638_v39  ;;  %v767_v11 = vsel %vm697_vm1, %v764_v59, %v766_v43  ;;  %v1055_v2 = vrot.slane %v546_v3, 2  ;;  %v1054_v60 = vsel %vm986_vm2, %v1052_v50, %v1053_v53  ;;  %v549_v30 = vadd.f32 %v453_v41, %v392_v40  ;;  %v3668_v50 = vpop.permute.xlu0 %1439 }
  0xf5   :  { %v3646_v37 = vsel %vm146_vm0, 0.0, %v4982_v44  ;;  %v1774_v6 = vsel %vm1531_vm3, %v1688_v19, 0.0  ;;  %v1578_v10 = vadd.f32 %v1577_v25, %v1576_v5  ;;  %v769_v13 = vrot.slane %v3633_v23, 1  ;;  %v3696_v24 = vpop.permute.xlu1 %1444 }
  0xf6   :  { %v547_v44 = vadd.f32 %v451_v56, %v3641_v21  ;;  %v3660_v46 = vmul.f32 %v3652_v32, %v1236_v33  ;;  %v1689_v1 = vmul.f32 %v3638_v39, %v3638_v39  ;;  %v1775_v42 = vadd.f32 %v1774_v6, %v1773_v26  ;;  %v4986_v6 = vld [vmem:[#allocation4_spill] sm:$0xff] }
  0xf7   :  { %v455_v59 = vadd.f32 %v196_v18, %v3567_v35  ;;  %v949_v3 = vadd.f32 %v767_v11, %v3595_v0  ;;  %v1237_v43 = vadd.f32 %v1054_v60, %v948_v36  ;;  %v456_v19 = vadd.f32 %v392_v40, %v3592_v31  ;;  %v71_v31 = vld [vmem:[%s4793_s0 + $0x1b0] sm:$0xff]  ;;  %v72_v18 = vld [vmem:[%s4793_s0 + $0x1b8] sm:$0xff] }
  0xf8   :  { %4983 = vst [vmem:[#allocation72_spill] sm:$0xff] %v3660_v46  ;;  %v768_v16 = vrot.slane %v547_v44, 1  ;;  %v1056_v5 = vsel %vm986_vm2, %v1053_v53, %v1055_v2  ;;  %v771_v41 = vrot.slane %v549_v30, 1  ;;  %v1058_v56 = vrot.slane %v3633_v23, 2 }
  0xf9   :  { %v1057_v33 = vrot.slane %v547_v44, 2  ;;  %v3672_v25 = vadd.f32 %v827_v55, %v3486_v14  ;;  %v3675_v26 = vadd.f32 %v484_v29, %v3646_v37  ;;  %v1579_v35 = vsel %vm1531_vm3, %v3638_v39, 0.0  ;;  %v4984_v29 = vld [vmem:[#allocation2_spill] sm:$0xff] }
  0xfa   :  { %v770_v0 = vsel %vm697_vm1, %v768_v16, %v769_v13  ;;  %v1690_v55 = vmul.f32 %v3660_v46, %v3660_v46  ;;  %v1580_v53 = vadd.f32 %v1579_v35, %v1578_v10  ;;  %v1776_v40 = vsel %vm1531_vm3, %v1689_v1, 0.0 }
  0xfb   :  { %v3690_v36 = vadd.f32 %v455_v59, %v4984_v29  ;;  %v1238_v11 = vadd.f32 %v1056_v5, %v949_v3  ;;  %v3693_v2 = vmul.f32 %v3668_v50, %v1237_v43  ;;  %v950_v60 = vadd.f32 %v770_v0, %v547_v44 }
  0xfc   :  { %v552_v16 = vadd.f32 %v456_v19, %v4986_v6  ;;  %v1777_v39 = vadd.f32 %v1776_v40, %v1775_v42  ;;  %v772_v38 = vsel %vm697_vm1, %v769_v13, %v771_v41  ;;  %v1060_v22 = vrot.slane %v549_v30, 2 }
  0xfd   :  { %4985 = vst [vmem:[#allocation2_spill] sm:$0xff] %v3693_v2  ;;  %v1059_v10 = vsel %vm986_vm2, %v1057_v33, %v1058_v56  ;;  %v4987_v1 = vrot.slane %v3502_v8, 2  ;;  %v4988_v59 = vrot.slane %v3486_v14, 2  ;;  %v230_v43 = vrot.slane %v71_v31, 7 }
  0xfe   :  { %v231_v5 = vrot.slane %v72_v18, 7  ;;  %v1581_v44 = vsel %vm1531_vm3, %v3660_v46, 0.0  ;;  %v1778_v42 = vsel %vm1531_vm3, %v1690_v55, 0.0  ;;  %v774_v13 = vrot.slane %v3690_v36, 1 }
  0xff   :  { %v3705_v3 = vsel %vm986_vm2, %v4988_v59, %v4987_v1  ;;  %v1582_v19 = vadd.f32 %v1581_v44, %v1580_v53  ;;  %v776_v30 = vrot.slane %v552_v16, 1  ;;  %v3712_v41 = vmul.f32 %v3696_v24, %v1238_v11  ;;  %v3721_v53 = vpop.permute.xlu0 %1449 }
 0x100   :  { %v1691_v8 = vmul.f32 %v3693_v2, %v3693_v2  ;;  %v951_v33 = vadd.f32 %v772_v38, %v3633_v23  ;;  %v1239_v35 = vadd.f32 %v1059_v10, %v950_v60  ;;  %v823_v0 = vrot.slane %v3675_v26, 1 }
 0x101   :  { %4989 = vst [vmem:[#allocation4_spill] sm:$0xff] %v3712_v41  ;;  %v488_v31 = vadd.f32 %v3438_v54, %v2919_v20  ;;  %v1779_v18 = vadd.f32 %v1778_v42, %v1777_v39  ;;  %v1061_v55 = vsel %vm986_vm2, %v1058_v56, %v1060_v22  ;;  %v3724_v40 = vsel %vm146_vm0, %v230_v43, %v231_v5  ;;  %v3736_v20 = vld [vmem:[%s4793_s0 + $0x1c0] sm:$0xff]  ;;  %v74_v22 = vld [vmem:[%s4793_s0 + $0x1c8] sm:$0xff] }
 0x102   :  { %v3727_v11 = vsel %vm146_vm0, %v231_v5, 0.0  ;;  %v489_v38 = vadd.f32 %v3467_v62, %v2922_v63  ;;  %v1583_v23 = vsel %vm1531_vm3, %v3693_v2, 0.0  ;;  %v777_v56 = vsel %vm697_vm1, %v774_v13, %v776_v30  ;;  %v3755_v30 = vpop.permute.xlu1 %1454 }
 0x103   :  { %v1584_v39 = vadd.f32 %v1583_v23, %v1582_v19  ;;  %v1063_v60 = vrot.slane %v3690_v36, 2  ;;  %v1065_v10 = vrot.slane %v552_v16, 2  ;;  %v1692_v63 = vmul.f32 %v3712_v41, %v3712_v41  ;;  %4991 = vst [vmem:[#allocation74_spill] sm:$0xff] %v3755_v30 }
 0x104   :  { %v1780_v1 = vsel %vm1531_vm3, %v1691_v8, 0.0  ;;  %v1240_v59 = vadd.f32 %v1061_v55, %v951_v33  ;;  %v3747_v5 = vmul.f32 %v3721_v53, %v1239_v35  ;;  %v3750_v44 = vadd.f32 %v488_v31, %v3724_v40 }
 0x105   :  { %v3753_v42 = vsel %vm146_vm0, 0.0, %v230_v43  ;;  %v1781_v19 = vadd.f32 %v1780_v1, %v1779_v18  ;;  %v454_v16 = vadd.f32 %v3641_v21, %v3570_v51  ;;  %v233_v23 = vrot.slane %v3736_v20, 7  ;;  %v4992_v18 = vld [vmem:[#allocation3_spill] sm:$0xff] }
 0x106   :  { %4990 = vst [vmem:[#allocation73_spill] sm:$0xff] %v3747_v5  ;;  %v234_v2 = vrot.slane %v74_v22, 7  ;;  %v1585_v8 = vsel %vm1531_vm3, %v3712_v41, 0.0  ;;  %v953_v33 = vadd.f32 %v777_v56, %v3690_v36  ;;  %v3764_v35 = vadd.f32 %v489_v38, %v3727_v11 }
 0x107   :  { %v1586_v31 = vadd.f32 %v1585_v8, %v1584_v39  ;;  %v1066_v43 = vsel %vm986_vm2, %v1063_v60, %v1065_v10  ;;  %v550_v55 = vadd.f32 %v454_v16, %v4992_v18  ;;  %v487_v1 = vadd.f32 %v3646_v37, %v3010_v7  ;;  %v3788_v8 = vpop.permute.xlu1 %1464 }
 0x108   :  { %v1782_v51 = vsel %vm1531_vm3, %v1692_v63, 0.0  ;;  %v3772_v21 = vmul.f32 %v3755_v30, %v1240_v59  ;;  %v1693_v20 = vmul.f32 %v3747_v5, %v3747_v5  ;;  %v491_v36 = vadd.f32 %v3724_v40, %v3438_v54  ;;  %4994 = vst [vmem:[#allocation75_spill] sm:$0xff] %v3788_v8 }
 0x109   :  { %v1783_v38 = vadd.f32 %v1782_v51, %v1781_v19  ;;  %v773_v22 = vrot.slane %v550_v55, 1  ;;  %v1062_v39 = vrot.slane %v550_v55, 2  ;;  %v3779_v56 = vsel %vm146_vm0, %v233_v23, %v234_v2 }
 0x10a   :  { %4993 = vst [vmem:[#allocation3_spill] sm:$0xff] %v3772_v21  ;;  %v492_v7 = vadd.f32 %v3727_v11, %v3467_v62  ;;  %v1587_v10 = vsel %vm1531_vm3, %v3747_v5, 0.0  ;;  %v1242_v63 = vadd.f32 %v1066_v43, %v953_v33  ;;  %v3786_v59 = vsel %vm146_vm0, %v234_v2, 0.0 }
 0x10b   :  { %v1588_v16 = vadd.f32 %v1587_v10, %v1586_v31  ;;  %v775_v54 = vsel %vm697_vm1, %v773_v22, %v774_v13  ;;  %v1064_v19 = vsel %vm986_vm2, %v1062_v39, %v1063_v60  ;;  %v1112_v51 = vrot.slane %v3675_v26, 2  ;;  %v3803_v22 = vpop.permute.xlu0 %1459 }
 0x10c   :  { %v1694_v41 = vmul.f32 %v3772_v21, %v3772_v21  ;;  %v1784_v62 = vsel %vm1531_vm3, %v1693_v20, 0.0  ;;  %v952_v46 = vadd.f32 %v775_v54, %v550_v55  ;;  %v4995_v33 = vrot.slane %v3486_v14, 1  ;;  %4996 = vst [vmem:[#allocation76_spill] sm:$0xff] %v3803_v22 }
 0x10d   :  { %v583_v31 = vadd.f32 %v487_v1, %v3753_v42  ;;  %v3801_v43 = vadd.f32 %v491_v36, %v3779_v56  ;;  %v1785_v13 = vadd.f32 %v1784_v62, %v1783_v38  ;;  %v588_v60 = vadd.f32 %v492_v7, %v3786_v59 }
 0x10e   :  { %v825_v2 = vsel %vm697_vm1, %v823_v0, %v4995_v33  ;;  %v1589_v39 = vsel %vm1531_vm3, %v3772_v21, 0.0  ;;  %v3809_v20 = vmul.f32 %v3788_v8, %v1242_v63  ;;  %v1241_v55 = vadd.f32 %v1064_v19, %v952_v46 }
 0x10f   :  { %v829_v10 = vrot.slane %v3750_v44, 1  ;;  %v831_v0 = vrot.slane %v3764_v35, 1  ;;  %v1118_v1 = vrot.slane %v3750_v44, 2  ;;  %v1590_v36 = vadd.f32 %v1589_v39, %v1588_v16 }
 0x110   :  { %v1120_v38 = vrot.slane %v3764_v35, 2  ;;  %v490_v54 = vadd.f32 %v3753_v42, %v3646_v37  ;;  %v1786_v7 = vsel %vm1531_vm3, %v1694_v41, 0.0  ;;  %v3819_v62 = vmul.f32 %v3803_v22, %v1241_v55 }
 0x111   :  { %v828_v63 = vrot.slane %v583_v31, 1  ;;  %v834_v46 = vrot.slane %v3801_v43, 1  ;;  %v3823_v19 = vsel %vm146_vm0, 0.0, %v233_v23  ;;  %v1787_v33 = vadd.f32 %v1786_v7, %v1785_v13 }
 0x112   :  { %4997 = vst [vmem:[#allocation77_spill] sm:$0xff] %v3819_v62  ;;  %v836_v21 = vrot.slane %v588_v60, 1  ;;  %v1696_v16 = vmul.f32 %v3809_v20, %v3809_v20  ;;  %v1591_v35 = vsel %vm1531_vm3, %v3819_v62, 0.0  ;;  %v1695_v37 = vmul.f32 %v3819_v62, %v3819_v62 }
 0x113   :  { %v1262_v41 = vadd.f32 %v3705_v3, %v3672_v25  ;;  %v4998_v39 = vrot.slane %v3486_v14, 2  ;;  %v832_v23 = vsel %vm697_vm1, %v829_v10, %v831_v0  ;;  %v1592_v13 = vadd.f32 %v1591_v35, %v1590_v36 }
 0x114   :  { %v972_v7 = vadd.f32 %v825_v2, %v3675_v26  ;;  %v586_v5 = vadd.f32 %v490_v54, %v3823_v19  ;;  %v1593_v8 = vsel %vm1531_vm3, %v3809_v20, 0.0  ;;  %v1788_v22 = vsel %vm1531_vm3, %v1695_v37, 0.0  ;;  %v3851_v54 = vld [vmem:[%s4793_s0 + $0x1d0] sm:$0xff] }
 0x115   :  { %v1114_v55 = vsel %vm986_vm2, %v1112_v51, %v4998_v39  ;;  %v830_v62 = vsel %vm697_vm1, %v828_v63, %v829_v10  ;;  %v1117_v30 = vrot.slane %v583_v31, 2  ;;  %v1594_v25 = vadd.f32 %v1593_v8, %v1592_v13  ;;  %v76_v8 = vld [vmem:[%s4793_s0 + $0x1d8] sm:$0xff] }
 0x116   :  { %v1789_v3 = vadd.f32 %v1788_v22, %v1787_v33  ;;  %v975_v14 = vadd.f32 %v832_v23, %v3750_v44  ;;  %v1121_v51 = vsel %vm986_vm2, %v1118_v1, %v1120_v38  ;;  %v837_v0 = vsel %vm697_vm1, %v834_v46, %v836_v21 }
 0x117   :  { %v1790_v26 = vsel %vm1531_vm3, %v1696_v16, 0.0  ;;  %v1123_v2 = vrot.slane %v3801_v43, 2  ;;  %v1125_v36 = vrot.slane %v588_v60, 2  ;;  %v1596_v44 = vadd.f32 %v3096_v61, %v1594_v25 }
 0x118   :  { %v1791_v22 = vadd.f32 %v1790_v26, %v1789_v3  ;;  %v1714_v21 = vmul.f32 %v3358_v12, %v3358_v12  ;;  %v1261_v10 = vadd.f32 %v1114_v55, %v972_v7  ;;  %v974_v38 = vadd.f32 %v830_v62, %v583_v31  ;;  %v5001_v3 = vld [vmem:[#allocation65_spill] sm:$0xff]  ;;  %v5003_v26 = vld [vmem:[#allocation32_spill] sm:$0xff] }
 0x119   :  { %v833_v63 = vrot.slane %v586_v5, 1  ;;  %v1713_v60 = vmul.f32 %v3491_v9, %v3491_v9  ;;  %v1119_v33 = vsel %vm986_vm2, %v1117_v30, %v1118_v1  ;;  %v1598_v16 = vadd.f32 %v3132_v17, %v1596_v44 }
 0x11a   :  { %v1793_v35 = vadd.f32 %v3117_v48, %v1791_v22  ;;  %v1264_v37 = vadd.f32 %v1121_v51, %v975_v14  ;;  %v977_v39 = vadd.f32 %v837_v0, %v3801_v43  ;;  %v236_v61 = vrot.slane %v3851_v54, 7 }
 0x11b   :  { %v237_v23 = vrot.slane %v76_v8, 7  ;;  %v3867_v13 = vmul.f32 %v3464_v47, %v1262_v41  ;;  %v1126_v31 = vsel %vm986_vm2, %v1123_v2, %v1125_v36  ;;  %v1600_v62 = vadd.f32 %v3092_v28, %v1598_v16  ;;  %v5004_v36 = vld [vmem:[#allocation35_spill] sm:$0xff] }
 0x11c   :  { %v1795_v55 = vadd.f32 %v3148_v49, %v1793_v35  ;;  %v3873_v30 = vmul.f32 %v3447_v34, %v1261_v10  ;;  %v1263_v17 = vadd.f32 %v1119_v33, %v974_v38  ;;  %v835_v48 = vsel %vm697_vm1, %v833_v63, %v834_v46  ;;  %v5006_v10 = vld [vmem:[#allocation39_spill] sm:$0xff]  ;;  %v5007_v63 = vld [vmem:[#allocation33_spill] sm:$0xff] }
 0x11d   :  { %4999 = vst [vmem:[#allocation78_spill] sm:$0xff] %v3867_v13  ;;  %v1122_v1 = vrot.slane %v586_v5, 2  ;;  %v494_v43 = vadd.f32 %v3779_v56, %v3724_v40  ;;  %v495_v47 = vadd.f32 %v3786_v59, %v3727_v11  ;;  %v1602_v41 = vadd.f32 %v3128_v45, %v1600_v62  ;;  %v5008_v62 = vld [vmem:[#allocation36_spill] sm:$0xff] }
 0x11e   :  { %v1797_v7 = vadd.f32 %v3108_v27, %v1795_v55  ;;  %v3883_v28 = vmul.f32 %v3534_v4, %v1264_v37  ;;  %v1266_v49 = vadd.f32 %v1126_v31, %v977_v39  ;;  %v3886_v34 = vsel %vm146_vm0, %v236_v61, %v237_v23  ;;  %v78_v31 = vld [vmem:[%s4793_s0 + $0x1e8] sm:$0xff] }
 0x11f   :  { %v3889_v46 = vsel %vm146_vm0, %v237_v23, 0.0  ;;  %v3892_v25 = vsel %vm1531_vm3, %v1714_v21, 0.0  ;;  %v976_v40 = vadd.f32 %v835_v48, %v586_v5  ;;  %v1604_v11 = vadd.f32 %v3176_v57, %v1602_v41  ;;  %v77_v23 = vld [vmem:[%s4793_s0 + $0x1e0] sm:$0xff] }
 0x120   :  { %5000 = vst [vmem:[#allocation79_spill] sm:$0xff] %v3883_v28  ;;  %v1799_v45 = vadd.f32 %v3139_v58, %v1797_v7  ;;  %v1716_v27 = vmul.f32 %v3867_v13, %v3867_v13  ;;  %v1715_v4 = vmul.f32 %v3873_v30, %v3873_v30  ;;  %v3901_v14 = vmul.f32 %v5001_v3, %v1263_v17  ;;  %v5009_v17 = vld [vmem:[#allocation40_spill] sm:$0xff] }
 0x121   :  { %v1124_v51 = vsel %vm986_vm2, %v1122_v1, %v1123_v2  ;;  %v3905_v0 = vadd.f32 %v494_v43, %v3886_v34  ;;  %v591_v5 = vadd.f32 %v495_v47, %v3889_v46  ;;  %v1606_v57 = vadd.f32 %v5003_v26, %v1604_v11 }
 0x122   :  { %5002 = vst [vmem:[#allocation65_spill] sm:$0xff] %v3901_v14  ;;  %v1801_v58 = vadd.f32 %v5004_v36, %v1799_v45  ;;  %v3912_v54 = vsel %vm1531_vm3, %v3491_v9, 0.0  ;;  %v3915_v8 = vsel %vm1531_vm3, %v1713_v60, 0.0  ;;  %v1718_v44 = vmul.f32 %v3883_v28, %v3883_v28  ;;  %v5012_v45 = vld [vmem:[#allocation38_spill] sm:$0xff]  ;;  %v5014_v36 = vld [vmem:[#allocation47_spill] sm:$0xff] }
 0x123   :  { %v3920_v2 = vmul.f32 %v3578_v52, %v1266_v49  ;;  %v3924_v22 = vsel %vm1531_vm3, %v3867_v13, 0.0  ;;  %v1265_v21 = vadd.f32 %v1124_v51, %v976_v40  ;;  %v1608_v38 = vadd.f32 %v5006_v10, %v1606_v57  ;;  %v5011_v40 = vld [vmem:[#allocation46_spill] sm:$0xff] }
 0x124   :  { %v1803_v33 = vadd.f32 %v5007_v63, %v1801_v58  ;;  %v3929_v16 = vsel %vm1531_vm3, %v1716_v27, 0.0  ;;  %v3933_v60 = vsel %vm1531_vm3, %v3873_v30, 0.0  ;;  %v3936_v35 = vsel %vm1531_vm3, %v1715_v4, 0.0  ;;  %v79_v63 = vld [vmem:[%s4793_s0 + $0x1f0] sm:$0xff] }
 0x125   :  { %5005 = vst [vmem:[#allocation32_spill] sm:$0xff] %v3920_v2  ;;  %v1717_v52 = vmul.f32 %v3901_v14, %v3901_v14  ;;  %v839_v37 = vrot.slane %v3905_v0, 1  ;;  %v841_v39 = vrot.slane %v591_v5, 1  ;;  %v1610_v55 = vadd.f32 %v5008_v62, %v1608_v38  ;;  %v5016_v62 = vld [vmem:[#allocation45_spill] sm:$0xff] }
 0x126   :  { %v1805_v48 = vadd.f32 %v5009_v17, %v1803_v33  ;;  %v3951_v1 = vsel %vm1531_vm3, %v3883_v28, 0.0  ;;  %v3954_v43 = vsel %vm1531_vm3, %v1718_v44, 0.0  ;;  %v1720_v47 = vmul.f32 %v3920_v2, %v3920_v2  ;;  %v80_v33 = vld [vmem:[%s4793_s0 + $0x1f8] sm:$0xff] }
 0x127   :  { %v493_v41 = vadd.f32 %v3823_v19, %v3753_v42  ;;  %v3961_v7 = vmul.f32 %v3576_v15, %v1265_v21  ;;  %v373_v49 = vsel %vm146_vm0, 0.0, %v236_v61  ;;  %v1612_v11 = vadd.f32 %v5011_v40, %v1610_v55  ;;  %v5013_v61 = vld [vmem:[#allocation43_spill] sm:$0xff] }
 0x128   :  { %v1807_v27 = vadd.f32 %v5012_v45, %v1805_v48  ;;  %v3968_v4 = vsel %vm1531_vm3, %v3901_v14, 0.0  ;;  %v3971_v3 = vsel %vm1531_vm3, %v1717_v52, 0.0  ;;  %v239_v51 = vrot.slane %v77_v23, 7  ;;  %v5015_v23 = vld [vmem:[#allocation49_spill] sm:$0xff] }
 0x129   :  { %5010 = vst [vmem:[#allocation35_spill] sm:$0xff] %v3961_v7  ;;  %v240_v26 = vrot.slane %v78_v31, 7  ;;  %v3975_v42 = vsel %vm1531_vm3, %v3920_v2, 0.0  ;;  %v842_v15 = vsel %vm697_vm1, %v839_v37, %v841_v39  ;;  %v1614_v57 = vadd.f32 %v5013_v61, %v1612_v11  ;;  %v5017_v11 = vld [vmem:[#allocation48_spill] sm:$0xff] }
 0x12a   :  { %v1809_v58 = vadd.f32 %v5014_v36, %v1807_v27  ;;  %v3981_v44 = vsel %vm1531_vm3, %v1720_v47, 0.0  ;;  %v1128_v21 = vrot.slane %v3905_v0, 2  ;;  %v1130_v10 = vrot.slane %v591_v5, 2  ;;  %v5018_v27 = vld [vmem:[#allocation51_spill] sm:$0xff] }
 0x12b   :  { %v589_v38 = vadd.f32 %v493_v41, %v373_v49  ;;  %v3992_v52 = vsel %vm1531_vm3, %v3961_v7, 0.0  ;;  %v497_v39 = vadd.f32 %v3886_v34, %v3779_v56  ;;  %v1616_v31 = vadd.f32 %v5015_v23, %v1614_v57 }
 0x12c   :  { %v1811_v5 = vadd.f32 %v5016_v62, %v1809_v58  ;;  %v979_v55 = vadd.f32 %v842_v15, %v3905_v0  ;;  %v241_v17 = vsel %vm146_vm0, %v239_v51, %v240_v26  ;;  %v374_v48 = vsel %vm146_vm0, 0.0, %v239_v51  ;;  %v5019_v51 = vld [vmem:[#allocation55_spill] sm:$0xff] }
 0x12d   :  { %v496_v47 = vadd.f32 %v373_v49, %v3823_v19  ;;  %v242_v41 = vrot.slane %v79_v63, 7  ;;  %v243_v40 = vrot.slane %v80_v33, 7  ;;  %v1618_v45 = vadd.f32 %v5017_v11, %v1616_v31  ;;  %v5020_v19 = vld [vmem:[#allocation50_spill] sm:$0xff] }
 0x12e   :  { %v1813_v61 = vadd.f32 %v5018_v27, %v1811_v5  ;;  %v1131_v56 = vsel %vm986_vm2, %v1128_v21, %v1130_v10  ;;  %v838_v36 = vrot.slane %v589_v38, 1  ;;  %v1127_v57 = vrot.slane %v589_v38, 2  ;;  %v5021_v11 = vld [vmem:[#allocation54_spill] sm:$0xff] }
 0x12f   :  { %v498_v58 = vadd.f32 %v3889_v46, %v3786_v59  ;;  %v407_v0 = vsel %vm146_vm0, %v240_v26, 0.0  ;;  %v4008_v15 = vadd.f32 %v497_v39, %v241_v17  ;;  %v1620_v23 = vadd.f32 %v5019_v51, %v1618_v45  ;;  %v5022_v39 = vld [vmem:[#allocation58_spill] sm:$0xff] }
 0x130   :  { %v1815_v63 = vadd.f32 %v5020_v19, %v1813_v61  ;;  %v4014_v33 = vmul.f32 %v3961_v7, %v3961_v7  ;;  %v592_v31 = vadd.f32 %v496_v47, %v374_v48  ;;  %v500_v10 = vadd.f32 %v241_v17, %v3886_v34  ;;  %v5023_v34 = vld [vmem:[#allocation59_spill] sm:$0xff]  ;;  %v5024_v7 = vld [vmem:[#allocation57_spill] sm:$0xff] }
 0x131   :  { %v499_v62 = vadd.f32 %v374_v48, %v373_v49  ;;  %v244_v5 = vsel %vm146_vm0, %v242_v41, %v243_v40  ;;  %v375_v59 = vsel %vm146_vm0, 0.0, %v242_v41  ;;  %v1622_v26 = vadd.f32 %v5021_v11, %v1620_v23 }
 0x132   :  { %v1817_v27 = vadd.f32 %v5022_v39, %v1815_v63  ;;  %v1268_v2 = vadd.f32 %v1131_v56, %v979_v55  ;;  %v840_v45 = vsel %vm697_vm1, %v838_v36, %v839_v37  ;;  %v1129_v61 = vsel %vm986_vm2, %v1127_v57, %v1128_v21  ;;  %v5025_v56 = vld [vmem:[#allocation11_spill] sm:$0xff]  ;;  %v5026_v36 = vld [vmem:[#allocation62_spill] sm:$0xff] }
 0x133   :  { %v594_v51 = vadd.f32 %v498_v58, %v407_v0  ;;  %v844_v19 = vrot.slane %v4008_v15, 1  ;;  %v501_v47 = vadd.f32 %v407_v0, %v3889_v46  ;;  %v1624_v49 = vadd.f32 %v5023_v34, %v1622_v26 }
 0x134   :  { %v1819_v28 = vadd.f32 %v5024_v7, %v1817_v27  ;;  %v843_v14 = vrot.slane %v592_v31, 1  ;;  %v408_v41 = vsel %vm146_vm0, %v243_v40, 0.0  ;;  %v596_v23 = vadd.f32 %v500_v10, %v244_v5  ;;  %v5027_v27 = vld [vmem:[#allocation61_spill] sm:$0xff] }
 0x135   :  { %v595_v11 = vadd.f32 %v499_v62, %v375_v59  ;;  %v503_v63 = vadd.f32 %v244_v5, %v241_v17  ;;  %v502_v55 = vadd.f32 %v375_v59, %v374_v48  ;;  %v1626_v37 = vadd.f32 %v5025_v56, %v1624_v49  ;;  %v5028_v62 = vld [vmem:[#allocation63_spill] sm:$0xff] }
 0x136   :  { %v1821_v21 = vadd.f32 %v5026_v36, %v1819_v28  ;;  %v978_v57 = vadd.f32 %v840_v45, %v589_v38  ;;  %v846_v58 = vrot.slane %v594_v51, 1  ;;  %v1133_v39 = vrot.slane %v4008_v15, 2 }
 0x137   :  { %v1132_v46 = vrot.slane %v592_v31, 2  ;;  %v597_v13 = vadd.f32 %v501_v47, %v408_v41  ;;  %v504_v26 = vadd.f32 %v408_v41, %v407_v0  ;;  %v1628_v7 = vadd.f32 %v3912_v54, %v1626_v37 }
 0x138   :  { %v1823_v34 = vadd.f32 %v5027_v27, %v1821_v21  ;;  %v4034_v40 = vmul.f32 %v3652_v32, %v1268_v2  ;;  %v845_v17 = vsel %vm697_vm1, %v843_v14, %v844_v19  ;;  %v849_v48 = vrot.slane %v596_v23, 1 }
 0x139   :  { %v848_v10 = vrot.slane %v595_v11, 1  ;;  %v599_v28 = vadd.f32 %v503_v63, %v4984_v29  ;;  %v598_v38 = vadd.f32 %v502_v55, %v4992_v18  ;;  %v1630_v5 = vadd.f32 %v5028_v62, %v1628_v7 }
 0x13a   :  { %v1825_v59 = vadd.f32 %v3915_v8, %v1823_v34  ;;  %v1267_v0 = vadd.f32 %v1129_v61, %v978_v57  ;;  %v847_v54 = vsel %vm697_vm1, %v844_v19, %v846_v58  ;;  %v1135_v45 = vrot.slane %v594_v51, 2  ;;  %v5029_v19 = vld [vmem:[#allocation70_spill] sm:$0xff] }
 0x13b   :  { %v1134_v47 = vsel %vm986_vm2, %v1132_v46, %v1133_v39  ;;  %v851_v32 = vrot.slane %v597_v13, 1  ;;  %v600_v2 = vadd.f32 %v504_v26, %v4986_v6  ;;  %v1632_v14 = vadd.f32 %v3933_v60, %v1630_v5 }
 0x13c   :  { %v1827_v49 = vadd.f32 %v3892_v25, %v1825_v59  ;;  %v980_v29 = vadd.f32 %v845_v17, %v592_v31  ;;  %v1138_v41 = vrot.slane %v596_v23, 2  ;;  %v850_v18 = vsel %vm697_vm1, %v848_v10, %v849_v48 }
 0x13d   :  { %v1137_v63 = vrot.slane %v595_v11, 2  ;;  %v854_v55 = vrot.slane %v599_v28, 1  ;;  %v853_v8 = vrot.slane %v598_v38, 1  ;;  %v1634_v61 = vadd.f32 %v3924_v22, %v1632_v14 }
 0x13e   :  { %v1829_v51 = vadd.f32 %v3936_v35, %v1827_v49  ;;  %v4050_v56 = vmul.f32 %v5029_v19, %v1267_v0  ;;  %v981_v6 = vadd.f32 %v847_v54, %v4008_v15  ;;  %v1136_v60 = vsel %vm986_vm2, %v1133_v39, %v1135_v45 }
 0x13f   :  { %v1140_v37 = vrot.slane %v597_v13, 2  ;;  %v852_v25 = vsel %vm697_vm1, %v849_v48, %v851_v32  ;;  %v856_v31 = vrot.slane %v600_v2, 1  ;;  %v1636_v36 = vadd.f32 %v3968_v4, %v1634_v61 }
 0x140   :  { %v1831_v21 = vadd.f32 %v3929_v16, %v1829_v51  ;;  %v1269_v57 = vadd.f32 %v1134_v47, %v980_v29  ;;  %v982_v58 = vadd.f32 %v850_v18, %v595_v11  ;;  %v1139_v22 = vsel %vm986_vm2, %v1137_v63, %v1138_v41  ;;  %v5031_v51 = vld [vmem:[#allocation76_spill] sm:$0xff] }
 0x141   :  { %v1143_v35 = vrot.slane %v599_v28, 2  ;;  %v855_v46 = vsel %vm697_vm1, %v853_v8, %v854_v55  ;;  %v1142_v26 = vrot.slane %v598_v38, 2  ;;  %v1638_v15 = vadd.f32 %v3951_v1, %v1636_v36  ;;  %v5032_v36 = vld [vmem:[#allocation75_spill] sm:$0xff] }
 0x142   :  { %v1833_v39 = vadd.f32 %v3971_v3, %v1831_v21  ;;  %v1836_v13 = vsel %vm1531_vm3, %v4014_v33, 0.0  ;;  %v1270_v7 = vadd.f32 %v1136_v60, %v981_v6  ;;  %v983_v27 = vadd.f32 %v852_v25, %v596_v23 }
 0x143   :  { %v1141_v4 = vsel %vm986_vm2, %v1138_v41, %v1140_v37  ;;  %v857_v16 = vsel %vm697_vm1, %v854_v55, %v856_v31  ;;  %v1145_v11 = vrot.slane %v600_v2, 2  ;;  %v1640_v34 = vadd.f32 %v3992_v52, %v1638_v15 }
 0x144   :  { %v1835_v17 = vadd.f32 %v3954_v43, %v1833_v39  ;;  %v1721_v48 = vmul.f32 %v4050_v56, %v4050_v56  ;;  %v4070_v1 = vmul.f32 %v3668_v50, %v1269_v57  ;;  %v1271_v3 = vadd.f32 %v1139_v22, %v982_v58 }
 0x145   :  { %v984_v10 = vadd.f32 %v855_v46, %v598_v38  ;;  %v1722_v33 = vmul.f32 %v4034_v40, %v4034_v40  ;;  %v1144_v23 = vsel %vm986_vm2, %v1142_v26, %v1143_v35  ;;  %v1642_v62 = vadd.f32 %v3975_v42, %v1640_v34 }
 0x146   :  { %v1837_v5 = vadd.f32 %v1836_v13, %v1835_v17  ;;  %v1643_v52 = vsel %vm1531_vm3, %v4050_v56, 0.0  ;;  %v4079_v43 = vmul.f32 %v3696_v24, %v1270_v7  ;;  %v1272_v59 = vadd.f32 %v1141_v4, %v983_v27 }
 0x147   :  { %v985_v0 = vadd.f32 %v857_v16, %v599_v28  ;;  %v1645_v50 = vsel %vm1531_vm3, %v4034_v40, 0.0  ;;  %v1146_v38 = vsel %vm986_vm2, %v1143_v35, %v1145_v11  ;;  %v1644_v54 = vadd.f32 %v1643_v52, %v1642_v62 }
 0x148   :  { %v1839_v45 = vadd.f32 %v3981_v44, %v1837_v5  ;;  %v1840_v47 = vsel %vm1531_vm3, %v1721_v48, 0.0  ;;  %v1723_v42 = vmul.f32 %v4070_v1, %v4070_v1  ;;  %v4089_v32 = vmul.f32 %v3721_v53, %v1271_v3  ;;  %v5030_v44 = vld [vmem:[#allocation74_spill] sm:$0xff] }
 0x149   :  { %v1273_v24 = vadd.f32 %v1144_v23, %v984_v10  ;;  %v1842_v2 = vsel %vm1531_vm3, %v1722_v33, 0.0  ;;  %v1646_v28 = vadd.f32 %v1645_v50, %v1644_v54  ;;  %v1724_v49 = vmul.f32 %v4079_v43, %v4079_v43 }
 0x14a   :  { %v1841_v14 = vadd.f32 %v1840_v47, %v1839_v45  ;;  %v1647_v29 = vsel %vm1531_vm3, %v4070_v1, 0.0  ;;  %v4097_v41 = vmul.f32 %v5030_v44, %v1272_v59  ;;  %v1274_v18 = vadd.f32 %v1146_v38, %v985_v0  ;;  %v1869_v44 = vld [vmem:[%s4794_s2] sm:$0x1] }
 0x14b   :  { %v1648_v63 = vadd.f32 %v1647_v29, %v1646_v28  ;;  %v1649_v53 = vsel %vm1531_vm3, %v4079_v43, 0.0  ;;  %v1844_v8 = vsel %vm1531_vm3, %v1723_v42, 0.0  ;;  %v1725_v61 = vmul.f32 %v4089_v32, %v4089_v32 }
 0x14c   :  { %v1843_v55 = vadd.f32 %v1842_v2, %v1841_v14  ;;  %v4105_v19 = vmul.f32 %v5031_v51, %v1273_v24  ;;  %v1846_v37 = vsel %vm1531_vm3, %v1724_v49, 0.0  ;;  %v1726_v25 = vmul.f32 %v4097_v41, %v4097_v41 }
 0x14d   :  { %v1650_v6 = vadd.f32 %v1649_v53, %v1648_v63  ;;  %v1651_v31 = vsel %vm1531_vm3, %v4089_v32, 0.0  ;;  %v4113_v21 = vmul.f32 %v5032_v36, %v1274_v18  ;;  %v1653_v22 = vsel %vm1531_vm3, %v4097_v41, 0.0  ;;  %v4138_v53 = vld [vmem:[%s4795_s3] sm:$0x1] }
 0x14e   :  { %v1845_v60 = vadd.f32 %v1844_v8, %v1843_v55  ;;  %v1848_v35 = vsel %vm1531_vm3, %v1725_v61, 0.0  ;;  %v1727_v46 = vmul.f32 %v4105_v19, %v4105_v19  ;;  %v1850_v39 = vsel %vm1531_vm3, %v1726_v25, 0.0 }
 0x14f   :  { %v1652_v57 = vadd.f32 %v1651_v31, %v1650_v6  ;;  %v1728_v13 = vmul.f32 %v4113_v21, %v4113_v21  ;;  %v1655_v7 = vsel %vm1531_vm3, %v4105_v19, 0.0  ;;  %v1657_v16 = vsel %vm1531_vm3, %v4113_v21, 0.0  ;;  %v5033_v6 = vld [vmem:[#allocation14_spill] sm:$0xff]  ;;  %v5035_v31 = vld [vmem:[#allocation16_spill] sm:$0xff] }
 0x150   :  { %v1847_v58 = vadd.f32 %v1846_v37, %v1845_v60  ;;  %v1852_v11 = vsel %vm1531_vm3, %v1727_v46, 0.0  ;;  %v1874_v49 = vlaneseq  ;;  %v5034_v37 = vld [vmem:[#allocation13_spill] sm:$0xff]  ;;  %v5038_v46 = vld [vmem:[#allocation20_spill] sm:$0xff] }
 0x151   :  { %v1654_v26 = vadd.f32 %v1653_v22, %v1652_v57  ;;  %v1854_v48 = vsel %vm1531_vm3, %v1728_v13, 0.0  ;;  %v5036_v57 = vld [vmem:[#allocation18_spill] sm:$0xff]  ;;  %v5037_v22 = vld [vmem:[#allocation19_spill] sm:$0xff] }
 0x152   :  { %v1849_v15 = vadd.f32 %v1848_v35, %v1847_v58  ;;  %v4129_v29 = vshrl.u32 %v1874_v49, 7  ;;  %v5040_v13 = vld [vmem:[#allocation22_spill] sm:$0xff]  ;;  %v5054_v49 = vld [vmem:[#allocation67_spill] sm:$0xff] }
 0x153   :  { %v1656_v27 = vadd.f32 %v1655_v7, %v1654_v26 }
 0x154   :  { %v1851_v4 = vadd.f32 %v1850_v39, %v1849_v15  ;;  %v4872_v18 = vsub.s32 0, %v4129_v29  ;;  %v5039_v15 = vld [vmem:[#allocation21_spill] sm:$0xff] }
 0x155   :  { %v1658_v34 = vadd.f32 %v1657_v16, %v1656_v27  ;;  %v5041_v27 = vld [vmem:[#allocation26_spill] sm:$0xff]  ;;  %v5042_v16 = vld [vmem:[#allocation29_spill] sm:$0xff] }
 0x156   :  { %v1853_v17 = vadd.f32 %v1852_v11, %v1851_v4 }
 0x157   :  { %v1659_v3 = vrot.slane %v1658_v34, 4 }
 0x158   :  { %v1855_v10 = vadd.f32 %v1854_v48, %v1853_v17  ;;  %v5044_v48 = vld [vmem:[#allocation9_spill] sm:$0xff] }
 0x159   :  { %v1660_v33 = vadd.f32 %v1659_v3, %v1658_v34  ;;  %v5043_v34 = vld [vmem:[#allocation31_spill] sm:$0xff] }
 0x15a   :  { %v1856_v23 = vrot.slane %v1855_v10, 4 }
 0x15b   :  { %v1661_v62 = vrot.slane %v1660_v33, 2 }
 0x15c   :  { %v1857_v5 = vadd.f32 %v1856_v23, %v1855_v10  ;;  %v5045_v10 = vld [vmem:[#allocation42_spill] sm:$0xff]  ;;  %v5046_v23 = vld [vmem:[#allocation41_spill] sm:$0xff] }
 0x15d   :  { %v1662_v52 = vadd.f32 %v1661_v62, %v1660_v33 }
 0x15e   :  { %v1858_v59 = vrot.slane %v1857_v5, 2 }
 0x15f   :  { %v1663_v0 = vrot.slane %v1662_v52, 1 }
 0x160   :  { %v1859_v50 = vadd.f32 %v1858_v59, %v1857_v5  ;;  %v5047_v5 = vld [vmem:[#allocation56_spill] sm:$0xff] }
 0x161   :  { %v1664_v38 = vadd.f32 %v1663_v0, %v1662_v52  ;;  %v5048_v59 = vld [vmem:[#allocation52_spill] sm:$0xff] }
 0x162   :  { %v1860_v54 = vrot.slane %v1859_v50, 1 }
 0x163   :  { %v1862_v47 = vmul.f32 0.001953125, %v1664_v38 }
 0x164   :  { %v1861_v45 = vadd.f32 %v1860_v54, %v1859_v50  ;;  %v5049_v50 = vld [vmem:[#allocation64_spill] sm:$0xff] }
 0x165   :  { %v1864_v24 = vmul.f32 %v1862_v47, %v1862_v47  ;;  %v5050_v54 = vld [vmem:[#allocation60_spill] sm:$0xff] }
 0x166   :  { %v1863_v42 = vmul.f32 0.001953125, %v1861_v45 }
 0x168   :  { %v1865_v2 = vsub.f32 %v1863_v42, %v1864_v24  ;;  %v5052_v24 = vld [vmem:[#allocation12_spill] sm:$0xff] }
 0x16a   :  { %v1866_v28 = vmax.f32 %v1865_v2, 0.0 }
 0x16c   :  { %v1867_v14 = vadd.f32 1e-05, %v1866_v28  ;;  %v5053_v28 = vld [vmem:[#allocation66_spill] sm:$0xff] }
 0x16e   :  { %2084 = vrsqrt.f32 %v1867_v14 }
 0x17b   :  { %v2085_v63 = vpop.eup %2084 }
 0x17c   :  { %v1871_v55 = vmul.f32 %v2085_v63, %v1869_v44  ;;  %v5055_v63 = vld [vmem:[#allocation68_spill] sm:$0xff] }
 0x17e   :  { %v4140_v8 = vmul.f32 %v1871_v55, %v1862_v47  ;;  %v4144_v61 = vrot.slane %v1871_v55, %v4872_v18  ;;  %v5051_v47 = vld [vmem:[#allocation10_spill] sm:$0xff]  ;;  %v5079_v18 = vld [vmem:[#allocation15_spill] sm:$0xff] }
 0x180   :  { %v1873_v51 = vsub.f32 %v4138_v53, %v4140_v8  ;;  %v4150_v60 = vmul.f32 %v4144_v61, %v5033_v6  ;;  %v4154_v25 = vmul.f32 %v4144_v61, %v5034_v37  ;;  %v4158_v36 = vmul.f32 %v4144_v61, %v5035_v31  ;;  %v5056_v53 = vld [vmem:[#allocation69_spill] sm:$0xff]  ;;  %v5057_v6 = vld [vmem:[#allocation71_spill] sm:$0xff]  ;;  %v5058_v31 = vld [vmem:[#allocation72_spill] sm:$0xff] }
 0x181   :  { %v4162_v58 = vmul.f32 %v4144_v61, %v5036_v57  ;;  %v4166_v35 = vmul.f32 %v4144_v61, %v5037_v22  ;;  %v4170_v26 = vmul.f32 %v4144_v61, %v5038_v46  ;;  %v4174_v39 = vmul.f32 %v4144_v61, %v5039_v15  ;;  %v5059_v22 = vld [vmem:[#allocation2_spill] sm:$0xff]  ;;  %v5060_v15 = vld [vmem:[#allocation4_spill] sm:$0xff] }
 0x182   :  { %v4178_v7 = vmul.f32 %v4144_v61, %v5040_v13  ;;  %v4182_v4 = vmul.f32 %v4144_v61, %v5041_v27  ;;  %v4186_v11 = vmul.f32 %v4144_v61, %v5042_v16  ;;  %v4190_v17 = vmul.f32 %v4144_v61, %v5043_v34  ;;  %v5061_v27 = vld [vmem:[#allocation73_spill] sm:$0xff]  ;;  %v5062_v34 = vld [vmem:[#allocation3_spill] sm:$0xff] }
 0x183   :  { %v4194_v3 = vmul.f32 %v4144_v61, %v5044_v48  ;;  %v4198_v33 = vmul.f32 %v4144_v61, %v5045_v10  ;;  %v4202_v62 = vmul.f32 %v4144_v61, %v5046_v23  ;;  %v4206_v52 = vmul.f32 %v4144_v61, %v5047_v5  ;;  %v5063_v10 = vld [vmem:[#allocation77_spill] sm:$0xff] }
 0x184   :  { %v4210_v0 = vmul.f32 %v4144_v61, %v5048_v59  ;;  %v4214_v38 = vmul.f32 %v4144_v61, %v5049_v50  ;;  %v4218_v45 = vmul.f32 %v4144_v61, %v5050_v54  ;;  %v4222_v42 = vmul.f32 %v4144_v61, %v5051_v47  ;;  %v5064_v59 = vld [vmem:[#allocation24_spill] sm:$0xff]  ;;  %v5065_v54 = vld [vmem:[#allocation27_spill] sm:$0xff] }
 0x185   :  { %v4226_v2 = vmul.f32 %v4144_v61, %v5052_v24  ;;  %v4230_v14 = vmul.f32 %v4144_v61, %v5053_v28  ;;  %v4234_v44 = vmul.f32 %v4144_v61, %v5054_v49  ;;  %v4238_v55 = vmul.f32 %v4144_v61, %v5055_v63  ;;  %v5066_v24 = vld [vmem:[#allocation23_spill] sm:$0xff]  ;;  %v5067_v49 = vld [vmem:[#allocation25_spill] sm:$0xff] }
 0x186   :  { %v4242_v8 = vmul.f32 %v4144_v61, %v5056_v53  ;;  %v4246_v37 = vmul.f32 %v4144_v61, %v5057_v6  ;;  %v4250_v57 = vmul.f32 %v4144_v61, %v5058_v31  ;;  %v4254_v46 = vmul.f32 %v4144_v61, %v5059_v22  ;;  %v5068_v53 = vld [vmem:[#allocation30_spill] sm:$0xff]  ;;  %v5069_v6 = vld [vmem:[#allocation28_spill] sm:$0xff] }
 0x187   :  { %v4258_v13 = vmul.f32 %v4144_v61, %v5060_v15  ;;  %v4262_v16 = vmul.f32 %v4144_v61, %v5061_v27  ;;  %v4266_v48 = vmul.f32 %v4144_v61, %v5062_v34  ;;  %v4270_v23 = vmul.f32 %v4144_v61, %v5063_v10  ;;  %v5070_v22 = vld [vmem:[#allocation6_spill] sm:$0xff]  ;;  %v5071_v27 = vld [vmem:[#allocation5_spill] sm:$0xff]  ;;  %v5073_v10 = vld [vmem:[#allocation8_spill] sm:$0xff] }
 0x188   :  { %v4274_v5 = vmul.f32 %v4144_v61, %v3809_v20  ;;  %v4278_v50 = vmul.f32 %v4144_v61, %v5064_v59  ;;  %v4282_v47 = vmul.f32 %v4144_v61, %v5065_v54  ;;  %v4286_v28 = vmul.f32 %v4144_v61, %v5066_v24  ;;  %v5075_v54 = vld [vmem:[#allocation7_spill] sm:$0xff] }
 0x189   :  { %v4290_v63 = vmul.f32 %v4144_v61, %v5067_v49  ;;  %v4294_v20 = vmul.f32 %v4144_v61, %v5068_v53  ;;  %v4298_v31 = vmul.f32 %v4144_v61, %v5069_v6  ;;  %v4302_v15 = vmul.f32 %v4144_v61, %v5070_v22  ;;  %v5077_v49 = vld [vmem:[#allocation37_spill] sm:$0xff]  ;;  %v5078_v6 = vld [vmem:[#allocation34_spill] sm:$0xff] }
 0x18a   :  { %v4306_v34 = vmul.f32 %v4144_v61, %v5071_v27  ;;  %v4310_v59 = vmul.f32 %v4144_v61, %v5073_v10  ;;  %v4314_v24 = vmul.f32 %v4144_v61, %v5075_v54  ;;  %v4318_v53 = vmul.f32 %v4144_v61, %v5077_v49 }
 0x18b   :  { %v4322_v22 = vmul.f32 %v4144_v61, %v5078_v6  ;;  %v4326_v27 = vmul.f32 %v4144_v61, %v5079_v18  ;;  %v4342_v6 = vmul.f32 %v4144_v61, %v3491_v9  ;;  %v4346_v18 = vmul.f32 %v4144_v61, %v3358_v12 }
 0x18c   :  { %5072 = vst [vmem:[#allocation39_spill] sm:$0xff] %v4306_v34  ;;  %5074 = vst [vmem:[#allocation33_spill] sm:$0xff] %v4310_v59  ;;  %v5080_v34 = vld [vmem:[#allocation44_spill] sm:$0xff]  ;;  %v5082_v59 = vld [vmem:[#allocation17_spill] sm:$0xff] }
 0x18d   :  { %5076 = vst [vmem:[#allocation36_spill] sm:$0xff] %v4314_v24  ;;  %v4330_v10 = vmul.f32 %v4144_v61, %v5080_v34  ;;  %v4334_v54 = vmul.f32 %v4144_v61, %v5082_v59  ;;  %v5084_v24 = vld [vmem:[#allocation53_spill] sm:$0xff]  ;;  %5086 = vst [vmem:[#allocation43_spill] sm:$0xff] %v4342_v6  ;;  %v4350_v34 = vmul.f32 %v4144_v61, %v3873_v30  ;;  %v5091_v6 = vld [vmem:[#allocation35_spill] sm:$0xff] }
 0x18e   :  { %v4338_v49 = vmul.f32 %v4144_v61, %v5084_v24  ;;  %v4366_v12 = vmul.f32 %v4144_v61, %v5091_v6  ;;  %v4370_v30 = vmul.f32 %v4144_v61, %v4097_v41  ;;  %v4386_v6 = vmul.f32 %v4144_v61, %v4113_v21 }
 0x18f   :  { %5081 = vst [vmem:[#allocation40_spill] sm:$0xff] %v4330_v10  ;;  %5083 = vst [vmem:[#allocation46_spill] sm:$0xff] %v4334_v54  ;;  %v5087_v10 = vld [vmem:[#allocation78_spill] sm:$0xff]  ;;  %v5089_v54 = vld [vmem:[#allocation65_spill] sm:$0xff]  ;;  %v4406_v21 = vmul.f32 %v4144_v61, %v4089_v32 }
 0x190   :  { %5085 = vst [vmem:[#allocation38_spill] sm:$0xff] %v4338_v49  ;;  %v4354_v59 = vmul.f32 %v4144_v61, %v5087_v10  ;;  %v4358_v24 = vmul.f32 %v4144_v61, %v5089_v54  ;;  %v5090_v49 = vld [vmem:[#allocation79_spill] sm:$0xff]  ;;  %5092 = vst [vmem:[#allocation49_spill] sm:$0xff] %v4366_v12  ;;  %v4374_v10 = vmul.f32 %v4144_v61, %v4105_v19  ;;  %v5094_v12 = vsub.s32 0, %v4129_v29 }
 0x191   :  { %v4362_v9 = vmul.f32 %v4144_v61, %v5090_v49  ;;  %v4382_v49 = vmul.f32 %v4144_v61, %v4050_v56  ;;  %v4394_v19 = vmul.f32 %v4144_v61, %v4034_v40  ;;  %v4402_v56 = vmul.f32 %v4144_v61, %v4079_v43 }
 0x192   :  { %5088 = vst [vmem:[#allocation47_spill] sm:$0xff] %v4354_v59  ;;  %v5093_v59 = vld [vmem:[#allocation32_spill] sm:$0xff]  ;;  %v4390_v41 = vrot.slane %v1873_v51, %v5094_v12 }
 0x193   :  { %v4378_v54 = vmul.f32 %v4144_v61, %v5093_v59  ;;  %v4398_v59 = vmul.f32 %v4144_v61, %v4070_v1 }
 0x194   :  { %v1948_v29 = vadd.f32 %v4390_v41, %v4150_v60  ;;  %v1949_v51 = vadd.f32 %v4390_v41, %v4154_v25  ;;  %v1950_v40 = vadd.f32 %v4390_v41, %v4158_v36  ;;  %v1951_v1 = vadd.f32 %v4390_v41, %v4162_v58 }
 0x195   :  { %v1952_v43 = vadd.f32 %v4390_v41, %v4166_v35  ;;  %v1953_v12 = vadd.f32 %v4390_v41, %v4170_v26  ;;  %v1954_v32 = vadd.f32 %v4390_v41, %v4174_v39  ;;  %v1955_v61 = vadd.f32 %v4390_v41, %v4178_v7 }
 0x196   :  { %v1956_v60 = vadd.f32 %v4390_v41, %v4182_v4  ;;  %v1957_v25 = vadd.f32 %v4390_v41, %v4186_v11  ;;  %v1958_v36 = vadd.f32 %v4390_v41, %v4190_v17  ;;  %v1959_v58 = vadd.f32 %v4390_v41, %v4194_v3  ;;  %2012 = vst.msk [vmem:[%s4796_s4] sm:$0xff] %vm1531_vm3, %v1948_v29 }
 0x197   :  { %2013 = vst.msk [vmem:[%s4796_s4 + $0x8] sm:$0xff] %vm1531_vm3, %v1949_v51  ;;  %2014 = vst.msk [vmem:[%s4796_s4 + $0x10] sm:$0xff] %vm1531_vm3, %v1950_v40  ;;  %v1960_v35 = vadd.f32 %v4390_v41, %v4198_v33  ;;  %v1961_v26 = vadd.f32 %v4390_v41, %v4202_v62  ;;  %v1962_v39 = vadd.f32 %v4390_v41, %v4206_v52  ;;  %v5099_v51 = vld [vmem:[#allocation46_spill] sm:$0xff] }
 0x198   :  { %2015 = vst.msk [vmem:[%s4796_s4 + $0x18] sm:$0xff] %vm1531_vm3, %v1951_v1  ;;  %v1963_v7 = vadd.f32 %v4390_v41, %v4210_v0  ;;  %2016 = vst.msk [vmem:[%s4796_s4 + $0x20] sm:$0xff] %vm1531_vm3, %v1952_v43  ;;  %v1964_v4 = vadd.f32 %v4390_v41, %v4214_v38  ;;  %v1965_v11 = vadd.f32 %v4390_v41, %v4218_v45  ;;  %v5100_v1 = vld [vmem:[#allocation38_spill] sm:$0xff] }
 0x199   :  { %2017 = vst.msk [vmem:[%s4796_s4 + $0x28] sm:$0xff] %vm1531_vm3, %v1953_v12  ;;  %2018 = vst.msk [vmem:[%s4796_s4 + $0x30] sm:$0xff] %vm1531_vm3, %v1954_v32  ;;  %v1966_v17 = vadd.f32 %v4390_v41, %v4222_v42  ;;  %v1967_v3 = vadd.f32 %v4390_v41, %v4226_v2  ;;  %v1968_v33 = vadd.f32 %v4390_v41, %v4230_v14 }
 0x19a   :  { %2019 = vst.msk [vmem:[%s4796_s4 + $0x38] sm:$0xff] %vm1531_vm3, %v1955_v61  ;;  %2020 = vst.msk [vmem:[%s4796_s4 + $0x40] sm:$0xff] %vm1531_vm3, %v1956_v60  ;;  %v1969_v62 = vadd.f32 %v4390_v41, %v4234_v44  ;;  %v1970_v52 = vadd.f32 %v4390_v41, %v4238_v55  ;;  %v1971_v0 = vadd.f32 %v4390_v41, %v4242_v8  ;;  %v5102_v60 = vld [vmem:[#allocation47_spill] sm:$0xff] }
 0x19b   :  { %2021 = vst.msk [vmem:[%s4796_s4 + $0x48] sm:$0xff] %vm1531_vm3, %v1957_v25  ;;  %2022 = vst.msk [vmem:[%s4796_s4 + $0x50] sm:$0xff] %vm1531_vm3, %v1958_v36  ;;  %v1972_v38 = vadd.f32 %v4390_v41, %v4246_v37  ;;  %v1973_v45 = vadd.f32 %v4390_v41, %v4250_v57  ;;  %v1974_v42 = vadd.f32 %v4390_v41, %v4254_v46  ;;  %v5103_v36 = vld [vmem:[#allocation49_spill] sm:$0xff] }
 0x19c   :  { %2023 = vst.msk [vmem:[%s4796_s4 + $0x58] sm:$0xff] %vm1531_vm3, %v1959_v58  ;;  %2024 = vst.msk [vmem:[%s4796_s4 + $0x60] sm:$0xff] %vm1531_vm3, %v1960_v35  ;;  %v1975_v2 = vadd.f32 %v4390_v41, %v4258_v13  ;;  %v1976_v14 = vadd.f32 %v4390_v41, %v4262_v16  ;;  %v1977_v44 = vadd.f32 %v4390_v41, %v4266_v48 }
 0x19d   :  { %2025 = vst.msk [vmem:[%s4796_s4 + $0x68] sm:$0xff] %vm1531_vm3, %v1961_v26  ;;  %2026 = vst.msk [vmem:[%s4796_s4 + $0x70] sm:$0xff] %vm1531_vm3, %v1962_v39  ;;  %v1978_v55 = vadd.f32 %v4390_v41, %v4270_v23  ;;  %v1979_v8 = vadd.f32 %v4390_v41, %v4274_v5  ;;  %v1980_v37 = vadd.f32 %v4390_v41, %v4278_v50  ;;  %v5095_v5 = vld [vmem:[#allocation39_spill] sm:$0xff] }
 0x19e   :  { %2027 = vst.msk [vmem:[%s4796_s4 + $0x78] sm:$0xff] %vm1531_vm3, %v1963_v7  ;;  %2028 = vst.msk [vmem:[%s4796_s4 + $0x80] sm:$0xff] %vm1531_vm3, %v1964_v4  ;;  %v1981_v57 = vadd.f32 %v4390_v41, %v4282_v47  ;;  %v1982_v46 = vadd.f32 %v4390_v41, %v4286_v28  ;;  %v1983_v13 = vadd.f32 %v4390_v41, %v4290_v63  ;;  %v5096_v47 = vld [vmem:[#allocation33_spill] sm:$0xff]  ;;  %v5097_v63 = vld [vmem:[#allocation36_spill] sm:$0xff] }
 0x19f   :  { %2029 = vst.msk [vmem:[%s4796_s4 + $0x88] sm:$0xff] %vm1531_vm3, %v1965_v11  ;;  %2030 = vst.msk [vmem:[%s4796_s4 + $0x90] sm:$0xff] %vm1531_vm3, %v1966_v17  ;;  %v1984_v16 = vadd.f32 %v4390_v41, %v4294_v20  ;;  %v1985_v48 = vadd.f32 %v4390_v41, %v4298_v31  ;;  %v1986_v23 = vadd.f32 %v4390_v41, %v4302_v15 }
 0x1a0   :  { %2031 = vst.msk [vmem:[%s4796_s4 + $0x98] sm:$0xff] %vm1531_vm3, %v1967_v3  ;;  %2032 = vst.msk [vmem:[%s4796_s4 + $0xa0] sm:$0xff] %vm1531_vm3, %v1968_v33  ;;  %v1987_v50 = vadd.f32 %v4390_v41, %v5095_v5  ;;  %v1988_v28 = vadd.f32 %v4390_v41, %v5096_v47  ;;  %v1989_v20 = vadd.f32 %v4390_v41, %v5097_v63 }
 0x1a1   :  { %2033 = vst.msk [vmem:[%s4796_s4 + $0xa8] sm:$0xff] %vm1531_vm3, %v1969_v62  ;;  %2034 = vst.msk [vmem:[%s4796_s4 + $0xb0] sm:$0xff] %vm1531_vm3, %v1970_v52  ;;  %v1990_v31 = vadd.f32 %v4390_v41, %v4318_v53  ;;  %v1991_v15 = vadd.f32 %v4390_v41, %v4322_v22  ;;  %v1992_v53 = vadd.f32 %v4390_v41, %v4326_v27  ;;  %v5098_v22 = vld [vmem:[#allocation40_spill] sm:$0xff]  ;;  %v5101_v27 = vld [vmem:[#allocation43_spill] sm:$0xff] }
 0x1a2   :  { %2035 = vst.msk [vmem:[%s4796_s4 + $0xb8] sm:$0xff] %vm1531_vm3, %v1971_v0  ;;  %2036 = vst.msk [vmem:[%s4796_s4 + $0xc0] sm:$0xff] %vm1531_vm3, %v1972_v38  ;;  %v1993_v29 = vadd.f32 %v4390_v41, %v5098_v22  ;;  %v1994_v40 = vadd.f32 %v4390_v41, %v5099_v51  ;;  %v1995_v43 = vadd.f32 %v4390_v41, %v5100_v1 }
 0x1a3   :  { %2037 = vst.msk [vmem:[%s4796_s4 + $0xc8] sm:$0xff] %vm1531_vm3, %v1973_v45  ;;  %2038 = vst.msk [vmem:[%s4796_s4 + $0xd0] sm:$0xff] %vm1531_vm3, %v1974_v42  ;;  %v1996_v12 = vadd.f32 %v4390_v41, %v5101_v27  ;;  %v1997_v32 = vadd.f32 %v4390_v41, %v4346_v18  ;;  %v1998_v61 = vadd.f32 %v4390_v41, %v4350_v34 }
 0x1a4   :  { %2039 = vst.msk [vmem:[%s4796_s4 + $0xd8] sm:$0xff] %vm1531_vm3, %v1975_v2  ;;  %2040 = vst.msk [vmem:[%s4796_s4 + $0xe0] sm:$0xff] %vm1531_vm3, %v1976_v14  ;;  %v1999_v25 = vadd.f32 %v4390_v41, %v5102_v60  ;;  %v2000_v18 = vadd.f32 %v4390_v41, %v4358_v24  ;;  %v2001_v34 = vadd.f32 %v4390_v41, %v4362_v9 }
 0x1a5   :  { %2041 = vst.msk [vmem:[%s4796_s4 + $0xe8] sm:$0xff] %vm1531_vm3, %v1977_v44  ;;  %2042 = vst.msk [vmem:[%s4796_s4 + $0xf0] sm:$0xff] %vm1531_vm3, %v1978_v55  ;;  %v2002_v58 = vadd.f32 %v4390_v41, %v5103_v36  ;;  %v2003_v35 = vadd.f32 %v4390_v41, %v4378_v54  ;;  %v2004_v24 = vadd.f32 %v4390_v41, %v4382_v49 }
 0x1a6   :  { %2043 = vst.msk [vmem:[%s4796_s4 + $0xf8] sm:$0xff] %vm1531_vm3, %v1979_v8  ;;  %2044 = vst.msk [vmem:[%s4796_s4 + $0x100] sm:$0xff] %vm1531_vm3, %v1980_v37  ;;  %v2005_v9 = vadd.f32 %v4390_v41, %v4394_v19  ;;  %v2006_v54 = vadd.f32 %v4390_v41, %v4398_v59  ;;  %v2007_v26 = vadd.f32 %v4390_v41, %v4402_v56 }
 0x1a7   :  { %2045 = vst.msk [vmem:[%s4796_s4 + $0x108] sm:$0xff] %vm1531_vm3, %v1981_v57  ;;  %2046 = vst.msk [vmem:[%s4796_s4 + $0x110] sm:$0xff] %vm1531_vm3, %v1982_v46  ;;  %v2008_v49 = vadd.f32 %v4390_v41, %v4406_v21  ;;  %v2009_v19 = vadd.f32 %v4390_v41, %v4370_v30  ;;  %v2010_v59 = vadd.f32 %v4390_v41, %v4374_v10 }
 0x1a8   :  { %2047 = vst.msk [vmem:[%s4796_s4 + $0x118] sm:$0xff] %vm1531_vm3, %v1983_v13  ;;  %2048 = vst.msk [vmem:[%s4796_s4 + $0x120] sm:$0xff] %vm1531_vm3, %v1984_v16  ;;  %v2011_v56 = vadd.f32 %v4390_v41, %v4386_v6 }
 0x1a9   :  { %2049 = vst.msk [vmem:[%s4796_s4 + $0x128] sm:$0xff] %vm1531_vm3, %v1985_v48  ;;  %2050 = vst.msk [vmem:[%s4796_s4 + $0x130] sm:$0xff] %vm1531_vm3, %v1986_v23 }
 0x1aa   :  { %2051 = vst.msk [vmem:[%s4796_s4 + $0x138] sm:$0xff] %vm1531_vm3, %v1987_v50  ;;  %2052 = vst.msk [vmem:[%s4796_s4 + $0x140] sm:$0xff] %vm1531_vm3, %v1988_v28 }
 0x1ab   :  { %2053 = vst.msk [vmem:[%s4796_s4 + $0x148] sm:$0xff] %vm1531_vm3, %v1989_v20  ;;  %2054 = vst.msk [vmem:[%s4796_s4 + $0x150] sm:$0xff] %vm1531_vm3, %v1990_v31 }
 0x1ac   :  { %2055 = vst.msk [vmem:[%s4796_s4 + $0x158] sm:$0xff] %vm1531_vm3, %v1991_v15  ;;  %2056 = vst.msk [vmem:[%s4796_s4 + $0x160] sm:$0xff] %vm1531_vm3, %v1992_v53 }
 0x1ad   :  { %2057 = vst.msk [vmem:[%s4796_s4 + $0x168] sm:$0xff] %vm1531_vm3, %v1993_v29  ;;  %2058 = vst.msk [vmem:[%s4796_s4 + $0x170] sm:$0xff] %vm1531_vm3, %v1994_v40 }
 0x1ae   :  { %2059 = vst.msk [vmem:[%s4796_s4 + $0x178] sm:$0xff] %vm1531_vm3, %v1995_v43  ;;  %2060 = vst.msk [vmem:[%s4796_s4 + $0x180] sm:$0xff] %vm1531_vm3, %v1996_v12 }
 0x1af   :  { %2061 = vst.msk [vmem:[%s4796_s4 + $0x188] sm:$0xff] %vm1531_vm3, %v1997_v32  ;;  %2062 = vst.msk [vmem:[%s4796_s4 + $0x190] sm:$0xff] %vm1531_vm3, %v1998_v61 }
 0x1b0   :  { %2063 = vst.msk [vmem:[%s4796_s4 + $0x198] sm:$0xff] %vm1531_vm3, %v1999_v25  ;;  %2064 = vst.msk [vmem:[%s4796_s4 + $0x1a0] sm:$0xff] %vm1531_vm3, %v2000_v18 }
 0x1b1   :  { %2065 = vst.msk [vmem:[%s4796_s4 + $0x1a8] sm:$0xff] %vm1531_vm3, %v2001_v34  ;;  %2066 = vst.msk [vmem:[%s4796_s4 + $0x1b0] sm:$0xff] %vm1531_vm3, %v2002_v58 }
 0x1b2   :  { %2067 = vst.msk [vmem:[%s4796_s4 + $0x1b8] sm:$0xff] %vm1531_vm3, %v2003_v35  ;;  %2068 = vst.msk [vmem:[%s4796_s4 + $0x1c0] sm:$0xff] %vm1531_vm3, %v2004_v24 }
 0x1b3   :  { %2069 = vst.msk [vmem:[%s4796_s4 + $0x1c8] sm:$0xff] %vm1531_vm3, %v2005_v9  ;;  %2070 = vst.msk [vmem:[%s4796_s4 + $0x1d0] sm:$0xff] %vm1531_vm3, %v2006_v54 }
 0x1b4   :  { %2071 = vst.msk [vmem:[%s4796_s4 + $0x1d8] sm:$0xff] %vm1531_vm3, %v2007_v26  ;;  %2072 = vst.msk [vmem:[%s4796_s4 + $0x1e0] sm:$0xff] %vm1531_vm3, %v2008_v49 }
 0x1b5   :  { %2073 = vst.msk [vmem:[%s4796_s4 + $0x1e8] sm:$0xff] %vm1531_vm3, %v2009_v19  ;;  %2074 = vst.msk [vmem:[%s4796_s4 + $0x1f0] sm:$0xff] %vm1531_vm3, %v2010_v59 }
 0x1b6   :  { %2075 = vst.msk [vmem:[%s4796_s4 + $0x1f8] sm:$0xff] %vm1531_vm3, %v2011_v56 }

</bundles_post_ra>
